<compile_context>
chip_gen: v6e
topology: v6e:2x2x1
jax: 0.10.0
libtpu: 0.0.40
codegen_flags: <defaults>
</compile_context>

<pallas_src>
import jax
import jax.numpy as jnp
from jax.experimental import pallas as pl
from jax.experimental.pallas import tpu as pltpu


def mlp_kernel(x_ref, w1_ref, b1_ref, w2_ref, b2_ref, o_ref):
    # Cast the activation tile to bf16 in-kernel (no extra HBM pass in the
    # wrapper); no-op if the producer already handed us bf16.
    x = x_ref[...].astype(jnp.bfloat16)
    # fc1: bf16 x bf16 MXU matmul, f32 accumulation.
    h = jnp.dot(x, w1_ref[...], preferred_element_type=jnp.float32)
    # bias + ReLU epilogue kept in f32 (VPU-friendly on every generation).
    h = jnp.maximum(h + b1_ref[...], 0.0)
    # fc2: cast activations to bf16 for a native MXU pass, accumulate in f32.
    y = jnp.dot(h.astype(jnp.bfloat16), w2_ref[...],
                preferred_element_type=jnp.float32)
    o_ref[...] = (y + b2_ref[...]).astype(o_ref.dtype)


def _round_up(n, m):
    return ((n + m - 1) // m) * m


def prepare_classifier_params(w1, b1, w2, b2):
    """One-time (model-init) prep: bf16 weights, class dim padded to 128.

    w1: (1280, 512); b1: (512,); w2: (512, C); b2: (C,).
    Returns (w1b, b1f, w2b, b2f, num_classes) ready for the forward call.
    """
    F, H = w1.shape
    C = w2.shape[1]
    C_pad = _round_up(C, 128)

    w1b = w1.astype(jnp.bfloat16)
    w2b = jnp.zeros((H, C_pad), jnp.bfloat16).at[:, :C].set(
        w2.astype(jnp.bfloat16))
    b1f = b1.astype(jnp.float32).reshape(1, H)
    b2f = jnp.zeros((1, C_pad), jnp.float32).at[:, :C].set(
        b2.astype(jnp.float32))
    return w1b, b1f, w2b, b2f, C


def custom_classifier_forward(x, w1b, b1f, w2b, b2f, num_classes,
                              *, tile_b=1024, out_dtype=jnp.float32):
    """x: (B, 1280) f32 or bf16; params from prepare_classifier_params."""
    B, F = x.shape
    H = w1b.shape[1]
    C_pad = w2b.shape[1]

    # 128-aligned batch tile when B is large (keeps MXU full); 8-aligned single
    # tile otherwise.  No padding of x — ragged last block handled by Pallas.
    tb = min(tile_b, _round_up(B, 8))
    grid = (pl.cdiv(B, tb),)

    # Right-sized VMEM limit: double-buffered x + out tiles, single-buffered
    # resident weights/biases, f32 hidden activations, plus slack.
    vmem_limit = int(
        2 * tb * F * jnp.dtype(x.dtype).itemsize          # x tiles (2 bufs)
        + (F * H + H * C_pad) * 2 + (H + C_pad) * 4       # resident weights/biases
        + 2 * tb * C_pad * jnp.dtype(out_dtype).itemsize  # out tiles (2 bufs)
        + tb * H * 4                                      # f32 hidden activations
        + (4 << 20)                                       # headroom
    )

    resident = pl.Buffered(1)  # constant index_map -> no double buffer
    out = pl.pallas_call(
        mlp_kernel,
        out_shape=jax.ShapeDtypeStruct((B, C_pad), out_dtype),
        grid=grid,
        in_specs=[
            pl.BlockSpec((tb, F), lambda i: (i, 0)),       # x: pipelined over batch
            pl.BlockSpec((F, H), lambda i: (0, 0),
                         pipeline_mode=resident),          # w1: VMEM-resident
            pl.BlockSpec((1, H), lambda i: (0, 0),
                         pipeline_mode=resident),          # b1: resident
            pl.BlockSpec((H, C_pad), lambda i: (0, 0),
                         pipeline_mode=resident),          # w2: resident (padded)
            pl.BlockSpec((1, C_pad), lambda i: (0, 0),
                         pipeline_mode=resident),          # b2: resident (padded)
        ],
        out_specs=pl.BlockSpec((tb, C_pad), lambda i: (i, 0)),
        compiler_params=pltpu.CompilerParams(
            dimension_semantics=("parallel",),  # batch tiles across v7x's 2 TCs
            vmem_limit_bytes=vmem_limit,
        ),
    )(x, w1b, b1f, w2b, b2f)

    return out[:, :num_classes]


if __name__ == "__main__":
    num_classes = 10
    batch = 8
    in_features = 1280
    hidden = 512

    key = jax.random.PRNGKey(0)
    kx, kw1, kb1, kw2, kb2 = jax.random.split(key, 5)

    x = jax.random.normal(kx, (batch, in_features), dtype=jnp.float32)
    # Deterministic synthetic parameters, stored transposed (in, out) vs torch.
    w1 = jax.random.normal(kw1, (in_features, hidden), dtype=jnp.float32) * 0.02
    b1 = jax.random.normal(kb1, (hidden,), dtype=jnp.float32) * 0.01
    w2 = jax.random.normal(kw2, (hidden, num_classes), dtype=jnp.float32) * 0.02
    b2 = jax.random.normal(kb2, (num_classes,), dtype=jnp.float32) * 0.01

    # One-time param prep (bf16 cast + class-dim padding) outside the hot path.
    w1b, b1f, w2b, b2f, C = prepare_classifier_params(w1, b1, w2, b2)

    out = custom_classifier_forward(x, w1b, b1f, w2b, b2f, C)
    out = jax.block_until_ready(out)
    assert out.shape == (batch, num_classes)

    # Reference with the same bf16 quantization of x/w1/w2/h (f32 accumulation),
    # matching torch semantics relu(x @ W1.T + b1) @ W2.T + b2.
    xq = x.astype(jnp.bfloat16).astype(jnp.float32)
    w1q = w1.astype(jnp.bfloat16).astype(jnp.float32)
    w2q = w2.astype(jnp.bfloat16).astype(jnp.float32)
    h_ref = jnp.maximum(xq @ w1q + b1[None, :], 0.0)
    ref = h_ref.astype(jnp.bfloat16).astype(jnp.float32) @ w2q + b2[None, :]
    assert jnp.allclose(out, ref, atol=2e-2, rtol=2e-2), (
        f"max abs err {jnp.max(jnp.abs(out - ref))}")

    print("KERNEL_OK")
</pallas_src>

<mosaic_0001>
module attributes {stable_mosaic.version = 11 : i64} {
  func.func @mlp_kernel(%arg0: i32, %arg1: memref<8x1280xf32, #tpu.memory_space<vmem>>, %arg2: memref<1280x512xbf16, #tpu.memory_space<vmem>>, %arg3: memref<1x512xf32, #tpu.memory_space<vmem>>, %arg4: memref<512x128xbf16, #tpu.memory_space<vmem>>, %arg5: memref<1x128xf32, #tpu.memory_space<vmem>>, %arg6: memref<8x128xf32, #tpu.memory_space<vmem>>) attributes {dimension_semantics = [#tpu.dimension_semantics<parallel>], iteration_bounds = array<i64: 1>, scalar_prefetch = 0 : i64, scratch_operands = 0 : i64, tpu.core_type = #tpu.core_type<tc>, window_params = [{transform_indices = @transform_0, window_bounds = array<i64: 8, 1280>}, {pipeline_mode = #tpu.pipeline_mode<synchronous>, transform_indices = @transform_1, window_bounds = array<i64: 1280, 512>}, {pipeline_mode = #tpu.pipeline_mode<synchronous>, transform_indices = @transform_2, window_bounds = array<i64: 1, 512>}, {pipeline_mode = #tpu.pipeline_mode<synchronous>, transform_indices = @transform_3, window_bounds = array<i64: 512, 128>}, {pipeline_mode = #tpu.pipeline_mode<synchronous>, transform_indices = @transform_4, window_bounds = array<i64: 1, 128>}, {transform_indices = @transform_5, window_bounds = array<i64: 8, 128>}]} {
    %c0 = arith.constant 0 : index
    %c0_0 = arith.constant 0 : index
    %0 = vector.load %arg1[%c0, %c0_0] : memref<8x1280xf32, #tpu.memory_space<vmem>>, vector<8x1280xf32>
    %1 = arith.truncf %0 : vector<8x1280xf32> to vector<8x1280xbf16>
    %c0_1 = arith.constant 0 : index
    %c0_2 = arith.constant 0 : index
    %2 = vector.load %arg2[%c0_1, %c0_2] : memref<1280x512xbf16, #tpu.memory_space<vmem>>, vector<1280x512xbf16>
    %cst = arith.constant dense<0.000000e+00> : vector<8x512xf32>
    %3 = tpu.matmul %1, %2, %cst {dimension_numbers = #tpu.dot_dimension_numbers<[1], [0], [0], [1], [0, 0, 1, 1], [], []>} : vector<8x1280xbf16>, vector<1280x512xbf16>, vector<8x512xf32> -> vector<8x512xf32>
    %c0_3 = arith.constant 0 : index
    %c0_4 = arith.constant 0 : index
    %4 = vector.load %arg3[%c0_3, %c0_4] : memref<1x512xf32, #tpu.memory_space<vmem>>, vector<1x512xf32>
    %5 = vector.broadcast %4 : vector<1x512xf32> to vector<8x512xf32>
    %6 = arith.addf %3, %5 : vector<8x512xf32>
    %cst_5 = arith.constant 0.000000e+00 : f32
    %7 = vector.broadcast %cst_5 : f32 to vector<8x512xf32>
    %8 = arith.maximumf %6, %7 : vector<8x512xf32>
    %9 = arith.truncf %8 : vector<8x512xf32> to vector<8x512xbf16>
    %c0_6 = arith.constant 0 : index
    %c0_7 = arith.constant 0 : index
    %10 = vector.load %arg4[%c0_6, %c0_7] : memref<512x128xbf16, #tpu.memory_space<vmem>>, vector<512x128xbf16>
    %cst_8 = arith.constant dense<0.000000e+00> : vector<8x128xf32>
    %11 = tpu.matmul %9, %10, %cst_8 {dimension_numbers = #tpu.dot_dimension_numbers<[1], [0], [0], [1], [0, 0, 1, 1], [], []>} : vector<8x512xbf16>, vector<512x128xbf16>, vector<8x128xf32> -> vector<8x128xf32>
    %c0_9 = arith.constant 0 : index
    %c0_10 = arith.constant 0 : index
    %12 = vector.load %arg5[%c0_9, %c0_10] : memref<1x128xf32, #tpu.memory_space<vmem>>, vector<1x128xf32>
    %13 = vector.broadcast %12 : vector<1x128xf32> to vector<8x128xf32>
    %14 = arith.addf %11, %13 : vector<8x128xf32>
    %c0_11 = arith.constant 0 : index
    %c0_12 = arith.constant 0 : index
    %15 = vector.load %arg6[%c0_11, %c0_12] : memref<8x128xf32, #tpu.memory_space<vmem>>, vector<8x128xf32>
    tpu.vector_store %arg6[%c0_11, %c0_12], %14 {strides = array<i32>} : memref<8x128xf32, #tpu.memory_space<vmem>>, vector<8x128xf32>,
    return
  }
  func.func @transform_0(%arg0: i32) -> (i32, i32) {
    %c0_i32 = arith.constant 0 : i32
    %c0_i32_0 = arith.constant 0 : i32
    return %arg0, %c0_i32 : i32, i32
  }
  func.func @transform_1(%arg0: i32) -> (i32, i32) {
    %c0_i32 = arith.constant 0 : i32
    %c0_i32_0 = arith.constant 0 : i32
    %c0_i32_1 = arith.constant 0 : i32
    return %c0_i32, %c0_i32_0 : i32, i32
  }
  func.func @transform_2(%arg0: i32) -> (i32, i32) {
    %c0_i32 = arith.constant 0 : i32
    %c0_i32_0 = arith.constant 0 : i32
    %c0_i32_1 = arith.constant 0 : i32
    return %c0_i32, %c0_i32_0 : i32, i32
  }
  func.func @transform_3(%arg0: i32) -> (i32, i32) {
    %c0_i32 = arith.constant 0 : i32
    %c0_i32_0 = arith.constant 0 : i32
    %c0_i32_1 = arith.constant 0 : i32
    return %c0_i32, %c0_i32_0 : i32, i32
  }
  func.func @transform_4(%arg0: i32) -> (i32, i32) {
    %c0_i32 = arith.constant 0 : i32
    %c0_i32_0 = arith.constant 0 : i32
    %c0_i32_1 = arith.constant 0 : i32
    return %c0_i32, %c0_i32_0 : i32, i32
  }
  func.func @transform_5(%arg0: i32) -> (i32, i32) {
    %c0_i32 = arith.constant 0 : i32
    %c0_i32_0 = arith.constant 0 : i32
    return %arg0, %c0_i32 : i32, i32
  }
}

</mosaic_0001>

<bundles_post_ra>
// kernel: tpu_custom_call.1
= control target key start
LH: loop header
LB: loop body
LE: loop exit
PB: predicated region body
PF: predicated region fallthrough
CT: control target
= control target key end

     0   :  { %10 = vsyncpa [#allocation3], 0  ;;  %s3988_s0 = inlined_call_operand.hbm [shape: f32[8,1280], index: 0, kind: input, shape index: {}]   ;;  %s3989_s1 = inlined_call_operand.hbm [shape: bf16[1280,512], index: 1, kind: input, shape index: {}]   ;;  %s3990_s2 = inlined_call_operand.hbm [shape: f32[1,512], index: 2, kind: input, shape index: {}]   ;;  %s3991_s3 = inlined_call_operand.hbm [shape: bf16[512,128], index: 3, kind: input, shape index: {}]   ;;  %s3992_s4 = inlined_call_operand.hbm [shape: f32[1,128], index: 4, kind: input, shape index: {}]   ;;  %s3993_s5 = inlined_call_operand.hbm [shape: f32[8,128], index: 5, kind: output, shape index: {}]  }
   0x1   :  { %11 = vsyncpa [#allocation6], 0 }
   0x2   :  { %12 = vsyncpa [#allocation9], 0 }
   0x3   :  { %13 = vsyncpa [#allocation4], 0  ;;  %s3872_s18 = smov [#allocation5]  }
   0x4   :  { %s29_s19 = sshll.u32 %s3872_s18, 4  ;;  %s30_s19 = int_to_ptr.vmem [resolvable:$true] %s29_s19 }
   0x5   :  { %s3752_s20 = scalar_lea.vmem %s30_s19, 40960  ;;  %p3757_p1 = scmp.lt.s32.totalorder %s30_s19, %s30_s19 }
   0x6   :  { %p3753_p0 = scmp.ne.s32.totalorder %s30_s19, %s3752_s20  ;;  %p3758_p2 = scmp.lt.s32.totalorder %s3752_s20, %s3752_s20 }
   0x8   :  { %p3759_p3 = por %p3758_p2, %p3757_p1 }
   0xa   :  { %p3760_p4 = pnand %p3759_p3, %p3753_p0 }
   0xc   :  { %3763 = shalt.err (!%p3760_p4)
}
   0xd   :  { %s3873_s21 = smov 256   ;;  %s3874_s22 = smov 16  }
   0xe   :  { %35 = dma.hbm_to_vmem [thread:$0]  %s3989_s1, 40960, %s30_s19, [#allocation6], %s3873_s21, %s3873_s21, %s3874_s22  }
   0xf   :  { %s3875_s25 = smov [#allocation8]  }
  0x10   :  { %s51_s26 = sshll.u32 %s3875_s25, 4  ;;  %s52_s26 = int_to_ptr.vmem [resolvable:$true] %s51_s26 }
  0x11   :  { %s3772_s27 = scalar_lea.vmem %s52_s26, 4096  ;;  %p3777_p6 = scmp.lt.s32.totalorder %s52_s26, %s52_s26 }
  0x12   :  { %p3773_p5 = scmp.ne.s32.totalorder %s52_s26, %s3772_s27  ;;  %p3778_p7 = scmp.lt.s32.totalorder %s3772_s27, %s3772_s27 }
  0x14   :  { %p3779_p8 = por %p3778_p7, %p3777_p6 }
  0x16   :  { %p3780_p9 = pnand %p3779_p8, %p3773_p5 }
  0x18   :  { %3783 = shalt.err (!%p3780_p9)
}
  0x19   :  { %s3876_s28 = smov 64   ;;  %s3877_s29 = smov 4  }
  0x1a   :  { %57 = dma.hbm_to_vmem [thread:$0]  %s3991_s3, 4096, %s52_s26, [#allocation9], %s3876_s28, %s3876_s28, %s3877_s29  }
  0x1b   :  { %s3878_s7 = smov [#allocation2]   ;;  %s3879_s9 = smov [#allocation7]  }
  0x1c   :  { %s20_s8 = sshll.u32 %s3878_s7, 4  ;;  %s42_s1 = sshll.u32 %s3879_s9, 4  ;;  %s21_s8 = int_to_ptr.vmem [resolvable:$true] %s20_s8  ;;  %s43_s1 = int_to_ptr.vmem [resolvable:$true] %s42_s1 }
  0x1d   :  { %s3792_s10 = scalar_lea.vmem %s21_s8, 1280  ;;  %p3797_p11 = scmp.lt.s32.totalorder %s21_s8, %s21_s8 }
  0x1e   :  { %p3793_p10 = scmp.ne.s32.totalorder %s21_s8, %s3792_s10  ;;  %p3798_p12 = scmp.lt.s32.totalorder %s3792_s10, %s3792_s10 }
  0x20   :  { %p3799_p13 = por %p3798_p12, %p3797_p11 }
  0x22   :  { %p3800_p0 = pnand %p3799_p13, %p3793_p10 }
  0x24   :  { %3803 = shalt.err (!%p3800_p0)
}
  0x25   :  { %23 = dma.hbm_to_vmem [thread:$0]  %s3988_s0, 1280, %s21_s8, [#allocation3]  }
  0x26   :  { %s3812_s13 = scalar_lea.vmem %s43_s1, 64  ;;  %p3817_p2 = scmp.lt.s32.totalorder %s43_s1, %s43_s1 }
  0x27   :  { %p3813_p1 = scmp.ne.s32.totalorder %s43_s1, %s3812_s13  ;;  %p3818_p3 = scmp.lt.s32.totalorder %s3812_s13, %s3812_s13 }
  0x29   :  { %p3819_p4 = por %p3818_p3, %p3817_p2 }
  0x2b   :  { %p3820_p5 = pnand %p3819_p4, %p3813_p1 }
  0x2d   :  { %3823 = shalt.err (!%p3820_p5)
}
  0x2e   :  { %45 = dma.hbm_to_vmem [thread:$0]  %s3990_s2, 64, %s43_s1, [#allocation6]  }
  0x2f   :  { %s3880_s15 = smov [#allocation10]  }
  0x30   :  { %s64_s16 = sshll.u32 %s3880_s15, 4  ;;  %s65_s16 = int_to_ptr.vmem [resolvable:$true] %s64_s16 }
  0x31   :  { %s3832_s17 = scalar_lea.vmem %s65_s16, 16  ;;  %s3836_s18 = scalar_lea.vmem %s65_s16, 32 }
  0x32   :  { %p3833_p6 = scmp.ne.s32.totalorder %s65_s16, %s3832_s17  ;;  %p3837_p7 = scmp.lt.s32.totalorder %s65_s16, %s65_s16 }
  0x33   :  { %p3838_p8 = scmp.lt.s32.totalorder %s3836_s18, %s3832_s17 }
  0x35   :  { %p3839_p9 = por %p3838_p8, %p3837_p7 }
  0x37   :  { %p3840_p10 = pnand %p3839_p9, %p3833_p6 }
  0x39   :  { %3843 = shalt.err (!%p3840_p10)
}
  0x3a   :  { %67 = dma.hbm_to_vmem [thread:$0]  %s3992_s4, 16, %s65_s16, [#allocation9]  }
  0x3b   :  { %3864 = dma.done.wait [#allocation3], 1280  }
  0x3c   :  { %3865 = vsyncadd [#allocation3], 4294966016 }
  0x3d   :  { %3866 = dma.done.wait [#allocation6], 41024  }
  0x3e   :  { %3867 = vsyncadd [#allocation6], 4294926272 }
  0x3f   :  { %3868 = dma.done.wait [#allocation9], 4112  }
  0x40   :  { %3869 = vsyncadd [#allocation9], 4294963184  ;;  %v3232_v0 = vld [vmem:[#allocation5 + $0xe4] ss:$16 sps:$4 sm:$0xff]   ;;  %v3236_v2 = vld [vmem:[#allocation5 + $0xe0] ss:$16 sps:$4 sm:$0xff]  }
  0x41   :  { %v3234_v1 = vld [vmem:[#allocation5 + $0x2e4] ss:$16 sps:$4 sm:$0xff]   ;;  %2046 = vmatprep.subr.bf16.mxu0 %v3232_v0  ;;  %v3237_v3 = vld [vmem:[#allocation5 + $0x2e0] ss:$16 sps:$4 sm:$0xff]   ;;  %v85_v46 = vld [vmem:[#allocation2 + $0x8] sm:$0xff]  ;;  %s3881_s2 = smov [#allocation11]  }
  0x42   :  { %2087 = vmatprep.subr.bf16.mxu1 %v3234_v1  ;;  %v3238_v4 = vld [vmem:[#allocation5 + $0xc4] ss:$16 sps:$4 sm:$0xff]   ;;  %2047 = vmatpush1.bf16.msra.mxu0 %v3236_v2  ;;  %v3242_v6 = vld [vmem:[#allocation5 + $0xc0] ss:$16 sps:$4 sm:$0xff]   ;;  %v3927_v49 = vpack.c.bf16 %v85_v46, %v85_v46  ;;  %v87_v50 = vld [vmem:[#allocation2 + $0x18] sm:$0xff]  ;;  %s2814_s4 = sshll.u32 %s3881_s2, 4  ;;  %s2815_s4 = int_to_ptr.vmem [resolvable:$true] %s2814_s4 }
  0x43   :  { %2088 = vmatpush1.bf16.msra.mxu1 %v3237_v3  ;;  %v3240_v5 = vld [vmem:[#allocation5 + $0x2c4] ss:$16 sps:$4 sm:$0xff]   ;;  %2048 = vmatprep.subr.bf16.mxu0 %v3238_v4  ;;  %v3243_v7 = vld [vmem:[#allocation5 + $0x2c0] ss:$16 sps:$4 sm:$0xff]   ;;  %v3929_v52 = vpack.c.bf16 %v87_v50, %v87_v50  ;;  %s3844_s20 = scalar_lea.vmem %s2815_s4, 128  ;;  %p3849_p12 = scmp.lt.s32.totalorder %s2815_s4, %s2815_s4 }
  0x44   :  { %2089 = vmatprep.subr.bf16.mxu1 %v3240_v5  ;;  %v3244_v8 = vld [vmem:[#allocation5 + $0xa4] ss:$16 sps:$4 sm:$0xff]   ;;  %v3248_v10 = vld [vmem:[#allocation5 + $0xa0] ss:$16 sps:$4 sm:$0xff]   ;;  %2078 = vmatprep.mubr.bf16.mxu0 %v3927_v49  ;;  %p3845_p11 = scmp.ne.s32.totalorder %s2815_s4, %s3844_s20  ;;  %p3850_p13 = scmp.lt.s32.totalorder %s3844_s20, %s3844_s20 }
  0x45   :  { %v3246_v9 = vld [vmem:[#allocation5 + $0x2a4] ss:$16 sps:$4 sm:$0xff]   ;;  %v3249_v11 = vld [vmem:[#allocation5 + $0x2a0] ss:$16 sps:$4 sm:$0xff]   ;;  %2119 = vmatprep.mubr.bf16.mxu1 %v3929_v52 }
  0x46   :  { %2049 = vmatpush1.bf16.msra.mxu0 %v3242_v6  ;;  %v3250_v12 = vld [vmem:[#allocation5 + $0x84] ss:$16 sps:$4 sm:$0xff]   ;;  %v3254_v14 = vld [vmem:[#allocation5 + $0x80] ss:$16 sps:$4 sm:$0xff]   ;;  %p3851_p0 = por %p3850_p13, %p3849_p12 }
  0x47   :  { %2090 = vmatpush1.bf16.msra.mxu1 %v3243_v7  ;;  %2050 = vmatprep.subr.bf16.mxu0 %v3244_v8  ;;  %v3252_v13 = vld [vmem:[#allocation5 + $0x284] ss:$16 sps:$4 sm:$0xff]   ;;  %v3255_v15 = vld [vmem:[#allocation5 + $0x280] ss:$16 sps:$4 sm:$0xff]  }
  0x48   :  { %2091 = vmatprep.subr.bf16.mxu1 %v3246_v9  ;;  %v3256_v16 = vld [vmem:[#allocation5 + $0x64] ss:$16 sps:$4 sm:$0xff]   ;;  %v3260_v18 = vld [vmem:[#allocation5 + $0x60] ss:$16 sps:$4 sm:$0xff]   ;;  %p3852_p1 = pnand %p3851_p0, %p3845_p11 }
  0x49   :  { %v3258_v17 = vld [vmem:[#allocation5 + $0x264] ss:$16 sps:$4 sm:$0xff]   ;;  %v3261_v19 = vld [vmem:[#allocation5 + $0x260] ss:$16 sps:$4 sm:$0xff]  }
  0x4a   :  { %2051 = vmatpush1.bf16.msra.mxu0 %v3248_v10  ;;  %v3262_v20 = vld [vmem:[#allocation5 + $0x44] ss:$16 sps:$4 sm:$0xff]   ;;  %v3266_v22 = vld [vmem:[#allocation5 + $0x40] ss:$16 sps:$4 sm:$0xff]  }
  0x4b   :  { %2092 = vmatpush1.bf16.msra.mxu1 %v3249_v11  ;;  %2052 = vmatprep.subr.bf16.mxu0 %v3250_v12  ;;  %v3264_v21 = vld [vmem:[#allocation5 + $0x244] ss:$16 sps:$4 sm:$0xff]   ;;  %v3267_v23 = vld [vmem:[#allocation5 + $0x240] ss:$16 sps:$4 sm:$0xff]  }
  0x4c   :  { %2093 = vmatprep.subr.bf16.mxu1 %v3252_v13  ;;  %v3268_v24 = vld [vmem:[#allocation5 + $0x24] ss:$16 sps:$4 sm:$0xff]   ;;  %v3272_v26 = vld [vmem:[#allocation5 + $0x20] ss:$16 sps:$4 sm:$0xff]  }
  0x4d   :  { %v3270_v25 = vld [vmem:[#allocation5 + $0x224] ss:$16 sps:$4 sm:$0xff]   ;;  %v3273_v27 = vld [vmem:[#allocation5 + $0x220] ss:$16 sps:$4 sm:$0xff]  }
  0x4e   :  { %2053 = vmatpush1.bf16.msra.mxu0 %v3254_v14  ;;  %v3274_v28 = vld [vmem:[#allocation5 + $0x4] ss:$16 sps:$4 sm:$0xff]   ;;  %v3278_v30 = vld [vmem:[#allocation5] ss:$16 sps:$4 sm:$0xff]  }
  0x4f   :  { %2094 = vmatpush1.bf16.msra.mxu1 %v3255_v15  ;;  %2054 = vmatprep.subr.bf16.mxu0 %v3256_v16  ;;  %v3276_v29 = vld [vmem:[#allocation5 + $0x204] ss:$16 sps:$4 sm:$0xff]   ;;  %v3279_v31 = vld [vmem:[#allocation5 + $0x200] ss:$16 sps:$4 sm:$0xff]  }
  0x50   :  { %2095 = vmatprep.subr.bf16.mxu1 %v3258_v17  ;;  %v3280_v32 = vld [vmem:[#allocation5 + $0x1e4] ss:$16 sps:$4 sm:$0xff]   ;;  %v3284_v34 = vld [vmem:[#allocation5 + $0x1e0] ss:$16 sps:$4 sm:$0xff]  }
  0x51   :  { %v3282_v33 = vld [vmem:[#allocation5 + $0x3e4] ss:$16 sps:$4 sm:$0xff]   ;;  %v3285_v35 = vld [vmem:[#allocation5 + $0x3e0] ss:$16 sps:$4 sm:$0xff]  }
  0x52   :  { %2055 = vmatpush1.bf16.msra.mxu0 %v3260_v18  ;;  %v3286_v36 = vld [vmem:[#allocation5 + $0x1c4] ss:$16 sps:$4 sm:$0xff]   ;;  %v3290_v38 = vld [vmem:[#allocation5 + $0x1c0] ss:$16 sps:$4 sm:$0xff]  }
  0x53   :  { %2096 = vmatpush1.bf16.msra.mxu1 %v3261_v19  ;;  %2056 = vmatprep.subr.bf16.mxu0 %v3262_v20  ;;  %v3288_v37 = vld [vmem:[#allocation5 + $0x3c4] ss:$16 sps:$4 sm:$0xff]   ;;  %v3291_v39 = vld [vmem:[#allocation5 + $0x3c0] ss:$16 sps:$4 sm:$0xff]  }
  0x54   :  { %2097 = vmatprep.subr.bf16.mxu1 %v3264_v21  ;;  %v3292_v40 = vld [vmem:[#allocation5 + $0x1a4] ss:$16 sps:$4 sm:$0xff]   ;;  %v3296_v42 = vld [vmem:[#allocation5 + $0x1a0] ss:$16 sps:$4 sm:$0xff]  }
  0x55   :  { %v3294_v41 = vld [vmem:[#allocation5 + $0x3a4] ss:$16 sps:$4 sm:$0xff]   ;;  %v3297_v43 = vld [vmem:[#allocation5 + $0x3a0] ss:$16 sps:$4 sm:$0xff]  }
  0x56   :  { %2057 = vmatpush1.bf16.msra.mxu0 %v3266_v22  ;;  %v3298_v44 = vld [vmem:[#allocation5 + $0x184] ss:$16 sps:$4 sm:$0xff]   ;;  %v3302_v47 = vld [vmem:[#allocation5 + $0x180] ss:$16 sps:$4 sm:$0xff]  }
  0x57   :  { %2098 = vmatpush1.bf16.msra.mxu1 %v3267_v23  ;;  %2058 = vmatprep.subr.bf16.mxu0 %v3268_v24  ;;  %v3300_v45 = vld [vmem:[#allocation5 + $0x384] ss:$16 sps:$4 sm:$0xff]   ;;  %v3303_v48 = vld [vmem:[#allocation5 + $0x380] ss:$16 sps:$4 sm:$0xff]  }
  0x58   :  { %2099 = vmatprep.subr.bf16.mxu1 %v3270_v25  ;;  %v3304_v51 = vld [vmem:[#allocation5 + $0x164] ss:$16 sps:$4 sm:$0xff]   ;;  %v3308_v54 = vld [vmem:[#allocation5 + $0x160] ss:$16 sps:$4 sm:$0xff]  }
  0x59   :  { %v3306_v53 = vld [vmem:[#allocation5 + $0x364] ss:$16 sps:$4 sm:$0xff]   ;;  %v3309_v55 = vld [vmem:[#allocation5 + $0x360] ss:$16 sps:$4 sm:$0xff]  }
  0x5a   :  { %2059 = vmatpush1.bf16.msra.mxu0 %v3272_v26  ;;  %v3310_v56 = vld [vmem:[#allocation5 + $0x144] ss:$16 sps:$4 sm:$0xff]   ;;  %v3314_v58 = vld [vmem:[#allocation5 + $0x140] ss:$16 sps:$4 sm:$0xff]  }
  0x5b   :  { %2100 = vmatpush1.bf16.msra.mxu1 %v3273_v27  ;;  %2060 = vmatprep.subr.bf16.mxu0 %v3274_v28  ;;  %v3312_v57 = vld [vmem:[#allocation5 + $0x344] ss:$16 sps:$4 sm:$0xff]   ;;  %v3315_v59 = vld [vmem:[#allocation5 + $0x340] ss:$16 sps:$4 sm:$0xff]  }
  0x5c   :  { %2101 = vmatprep.subr.bf16.mxu1 %v3276_v29  ;;  %v3316_v60 = vld [vmem:[#allocation5 + $0x124] ss:$16 sps:$4 sm:$0xff]   ;;  %v3320_v62 = vld [vmem:[#allocation5 + $0x120] ss:$16 sps:$4 sm:$0xff]  }
  0x5d   :  { %v3318_v61 = vld [vmem:[#allocation5 + $0x324] ss:$16 sps:$4 sm:$0xff]   ;;  %v3321_v63 = vld [vmem:[#allocation5 + $0x320] ss:$16 sps:$4 sm:$0xff]  }
  0x5e   :  { %2061 = vmatpush1.bf16.msra.mxu0 %v3278_v30  ;;  %v3322_v0 = vld [vmem:[#allocation5 + $0x104] ss:$16 sps:$4 sm:$0xff]   ;;  %v3326_v2 = vld [vmem:[#allocation5 + $0x100] ss:$16 sps:$4 sm:$0xff]  }
  0x5f   :  { %2102 = vmatpush1.bf16.msra.mxu1 %v3279_v31  ;;  %2062 = vmatprep.subr.bf16.mxu0 %v3280_v32  ;;  %v3324_v1 = vld [vmem:[#allocation5 + $0x304] ss:$16 sps:$4 sm:$0xff]   ;;  %v3327_v3 = vld [vmem:[#allocation5 + $0x300] ss:$16 sps:$4 sm:$0xff]  }
  0x60   :  { %2103 = vmatprep.subr.bf16.mxu1 %v3282_v33  ;;  %v84_v4 = vld [vmem:[#allocation2] sm:$0xff]  ;;  %v86_v5 = vld [vmem:[#allocation2 + $0x10] sm:$0xff] }
  0x61   :  { %v3330_v6 = vld [vmem:[#allocation5 + $0x4e4] ss:$16 sps:$4 sm:$0xff]   ;;  %v3933_v8 = vpack.c.bf16 %v84_v4, %v84_v4  ;;  %v3935_v9 = vpack.c.bf16 %v86_v5, %v86_v5  ;;  %v3328_v10 = vld [vmem:[#allocation5 + $0x4e0] ss:$16 sps:$4 sm:$0xff]  }
  0x62   :  { %2063 = vmatpush2.bf16.msra.mxu0 %v3284_v34  ;;  %v3333_v7 = vld [vmem:[#allocation5 + $0x6e4] ss:$16 sps:$4 sm:$0xff]   ;;  %v3331_v11 = vld [vmem:[#allocation5 + $0x6e0] ss:$16 sps:$4 sm:$0xff]   ;;  %v89_v34 = vld [vmem:[#allocation2 + $0x28] sm:$0xff] }
  0x63   :  { %2104 = vmatpush2.bf16.msra.mxu1 %v3285_v35  ;;  %2064 = vmatprep.subr.bf16.mxu0 %v3286_v36  ;;  %v3336_v12 = vld [vmem:[#allocation5 + $0x4c4] ss:$16 sps:$4 sm:$0xff]   ;;  %v3334_v14 = vld [vmem:[#allocation5 + $0x4c0] ss:$16 sps:$4 sm:$0xff]  }
  0x64   :  { %2105 = vmatprep.subr.bf16.mxu1 %v3288_v37  ;;  %v3339_v13 = vld [vmem:[#allocation5 + $0x6c4] ss:$16 sps:$4 sm:$0xff]   ;;  %v3337_v15 = vld [vmem:[#allocation5 + $0x6c0] ss:$16 sps:$4 sm:$0xff]   ;;  %v3939_v37 = vpack.c.bf16 %v89_v34, %v89_v34 }
  0x65   :  { %v3342_v16 = vld [vmem:[#allocation5 + $0x4a4] ss:$16 sps:$4 sm:$0xff]   ;;  %v3340_v18 = vld [vmem:[#allocation5 + $0x4a0] ss:$16 sps:$4 sm:$0xff]  }
  0x66   :  { %2065 = vmatpush2.bf16.msra.mxu0 %v3290_v38  ;;  %v3345_v17 = vld [vmem:[#allocation5 + $0x6a4] ss:$16 sps:$4 sm:$0xff]   ;;  %v3343_v19 = vld [vmem:[#allocation5 + $0x6a0] ss:$16 sps:$4 sm:$0xff]   ;;  %v91_v38 = vld [vmem:[#allocation2 + $0x38] sm:$0xff] }
  0x67   :  { %2106 = vmatpush2.bf16.msra.mxu1 %v3291_v39  ;;  %2066 = vmatprep.subr.bf16.mxu0 %v3292_v40  ;;  %v3348_v20 = vld [vmem:[#allocation5 + $0x484] ss:$16 sps:$4 sm:$0xff]   ;;  %v3346_v22 = vld [vmem:[#allocation5 + $0x480] ss:$16 sps:$4 sm:$0xff]   ;;  %v3941_v40 = vpack.c.bf16 %v91_v38, %v91_v38  ;;  %v3445_v38 = vld [vmem:[#allocation5 + $0x88] ss:$16 sps:$4 sm:$0xff]  }
  0x68   :  { %2107 = vmatprep.subr.bf16.mxu1 %v3294_v41  ;;  %v3351_v21 = vld [vmem:[#allocation5 + $0x684] ss:$16 sps:$4 sm:$0xff]   ;;  %v3349_v23 = vld [vmem:[#allocation5 + $0x680] ss:$16 sps:$4 sm:$0xff]  }
  0x69   :  { %v3354_v24 = vld [vmem:[#allocation5 + $0x464] ss:$16 sps:$4 sm:$0xff]   ;;  %v3352_v26 = vld [vmem:[#allocation5 + $0x460] ss:$16 sps:$4 sm:$0xff]  }
  0x6a   :  { %2067 = vmatpush2.bf16.msra.mxu0 %v3296_v42  ;;  %v3357_v25 = vld [vmem:[#allocation5 + $0x664] ss:$16 sps:$4 sm:$0xff]   ;;  %v3355_v27 = vld [vmem:[#allocation5 + $0x660] ss:$16 sps:$4 sm:$0xff]  }
  0x6b   :  { %2108 = vmatpush2.bf16.msra.mxu1 %v3297_v43  ;;  %2068 = vmatprep.subr.bf16.mxu0 %v3298_v44  ;;  %v3360_v28 = vld [vmem:[#allocation5 + $0x444] ss:$16 sps:$4 sm:$0xff]   ;;  %v3358_v30 = vld [vmem:[#allocation5 + $0x440] ss:$16 sps:$4 sm:$0xff]  }
  0x6c   :  { %2109 = vmatprep.subr.bf16.mxu1 %v3300_v45  ;;  %v3363_v29 = vld [vmem:[#allocation5 + $0x644] ss:$16 sps:$4 sm:$0xff]   ;;  %v3361_v31 = vld [vmem:[#allocation5 + $0x640] ss:$16 sps:$4 sm:$0xff]  }
  0x6d   :  { %v3366_v32 = vld [vmem:[#allocation5 + $0x424] ss:$16 sps:$4 sm:$0xff]   ;;  %v3364_v35 = vld [vmem:[#allocation5 + $0x420] ss:$16 sps:$4 sm:$0xff]  }
  0x6e   :  { %2069 = vmatpush2.bf16.msra.mxu0 %v3302_v47  ;;  %v3369_v33 = vld [vmem:[#allocation5 + $0x624] ss:$16 sps:$4 sm:$0xff]   ;;  %v3367_v36 = vld [vmem:[#allocation5 + $0x620] ss:$16 sps:$4 sm:$0xff]  }
  0x6f   :  { %2110 = vmatpush2.bf16.msra.mxu1 %v3303_v48  ;;  %2070 = vmatprep.subr.bf16.mxu0 %v3304_v51  ;;  %v3372_v39 = vld [vmem:[#allocation5 + $0x404] ss:$16 sps:$4 sm:$0xff]   ;;  %v3370_v42 = vld [vmem:[#allocation5 + $0x400] ss:$16 sps:$4 sm:$0xff]  }
  0x70   :  { %2111 = vmatprep.subr.bf16.mxu1 %v3306_v53  ;;  %v3375_v41 = vld [vmem:[#allocation5 + $0x604] ss:$16 sps:$4 sm:$0xff]   ;;  %v3373_v43 = vld [vmem:[#allocation5 + $0x600] ss:$16 sps:$4 sm:$0xff]  }
  0x71   :  { %v3378_v44 = vld [vmem:[#allocation5 + $0x5e4] ss:$16 sps:$4 sm:$0xff]   ;;  %v3376_v46 = vld [vmem:[#allocation5 + $0x5e0] ss:$16 sps:$4 sm:$0xff]  }
  0x72   :  { %2071 = vmatpush2.bf16.msra.mxu0 %v3308_v54  ;;  %v3381_v45 = vld [vmem:[#allocation5 + $0x7e4] ss:$16 sps:$4 sm:$0xff]   ;;  %v3379_v47 = vld [vmem:[#allocation5 + $0x7e0] ss:$16 sps:$4 sm:$0xff]  }
  0x73   :  { %2112 = vmatpush2.bf16.msra.mxu1 %v3309_v55  ;;  %2072 = vmatprep.subr.bf16.mxu0 %v3310_v56  ;;  %v3384_v48 = vld [vmem:[#allocation5 + $0x5c4] ss:$16 sps:$4 sm:$0xff]   ;;  %v3382_v51 = vld [vmem:[#allocation5 + $0x5c0] ss:$16 sps:$4 sm:$0xff]  }
  0x74   :  { %2113 = vmatprep.subr.bf16.mxu1 %v3312_v57  ;;  %v3387_v50 = vld [vmem:[#allocation5 + $0x7c4] ss:$16 sps:$4 sm:$0xff]   ;;  %v3385_v53 = vld [vmem:[#allocation5 + $0x7c0] ss:$16 sps:$4 sm:$0xff]  }
  0x75   :  { %v3390_v54 = vld [vmem:[#allocation5 + $0x5a4] ss:$16 sps:$4 sm:$0xff]   ;;  %v3388_v56 = vld [vmem:[#allocation5 + $0x5a0] ss:$16 sps:$4 sm:$0xff]  }
  0x76   :  { %2073 = vmatpush2.bf16.msra.mxu0 %v3314_v58  ;;  %v3393_v55 = vld [vmem:[#allocation5 + $0x7a4] ss:$16 sps:$4 sm:$0xff]   ;;  %v3391_v57 = vld [vmem:[#allocation5 + $0x7a0] ss:$16 sps:$4 sm:$0xff]  }
  0x77   :  { %2114 = vmatpush2.bf16.msra.mxu1 %v3315_v59  ;;  %2074 = vmatprep.subr.bf16.mxu0 %v3316_v60  ;;  %v3396_v58 = vld [vmem:[#allocation5 + $0x584] ss:$16 sps:$4 sm:$0xff]   ;;  %v3394_v60 = vld [vmem:[#allocation5 + $0x580] ss:$16 sps:$4 sm:$0xff]  }
  0x78   :  { %2115 = vmatprep.subr.bf16.mxu1 %v3318_v61  ;;  %v3399_v59 = vld [vmem:[#allocation5 + $0x784] ss:$16 sps:$4 sm:$0xff]   ;;  %v3397_v61 = vld [vmem:[#allocation5 + $0x780] ss:$16 sps:$4 sm:$0xff]  }
  0x79   :  { %v3406_v4 = vld [vmem:[#allocation5 + $0x540] ss:$16 sps:$4 sm:$0xff]   ;;  %v3444_v34 = vld [vmem:[#allocation5 + $0x884] ss:$16 sps:$4 sm:$0xff]  }
  0x7a   :  { %2075 = vmatpush2.bf16.msra.mxu0 %v3320_v62  ;;  %v3402_v62 = vld [vmem:[#allocation5 + $0x564] ss:$16 sps:$4 sm:$0xff]   ;;  %v3409_v5 = vld [vmem:[#allocation5 + $0x740] ss:$16 sps:$4 sm:$0xff]  }
  0x7b   :  { %2116 = vmatpush2.bf16.msra.mxu1 %v3321_v63  ;;  %2076 = vmatprep.subr.bf16.mxu0 %v3322_v0  ;;  %v3405_v63 = vld [vmem:[#allocation5 + $0x764] ss:$16 sps:$4 sm:$0xff]   ;;  %v3400_v0 = vld [vmem:[#allocation5 + $0x560] ss:$16 sps:$4 sm:$0xff]  }
  0x7c   :  { %2117 = vmatprep.subr.bf16.mxu1 %v3324_v1  ;;  %v3403_v1 = vld [vmem:[#allocation5 + $0x760] ss:$16 sps:$4 sm:$0xff]  }
  0x7e   :  { %2077 = vmatpush2.bf16.msra.mxu0 %v3326_v2  ;;  %v3408_v2 = vld [vmem:[#allocation5 + $0x544] ss:$16 sps:$4 sm:$0xff]  }
  0x7f   :  { %2118 = vmatpush2.bf16.msra.mxu1 %v3327_v3  ;;  %2128 = vmatprep.subr.bf16.mxu0 %v3330_v6  ;;  %v3411_v3 = vld [vmem:[#allocation5 + $0x744] ss:$16 sps:$4 sm:$0xff]  }
  0x80   :  { %2169 = vmatprep.subr.bf16.mxu1 %v3333_v7  ;;  %v3414_v6 = vld [vmem:[#allocation5 + $0x524] ss:$16 sps:$4 sm:$0xff]  }
  0x81   :  { %2079 = vmatmul.mubr.bf16.vlgmr.msra.gmra.mxu0 %v3933_v8  ;;  %v3417_v7 = vld [vmem:[#allocation5 + $0x724] ss:$16 sps:$4 sm:$0xff]  }
  0x82   :  { %2120 = vmatmul.mubr.bf16.vlgmr.msra.gmra.mxu1 %v3935_v9  ;;  %2129 = vmatpush1.bf16.msra.mxu0 %v3328_v10  ;;  %v3412_v10 = vld [vmem:[#allocation5 + $0x520] ss:$16 sps:$4 sm:$0xff]  }
  0x83   :  { %2170 = vmatpush1.bf16.msra.mxu1 %v3331_v11  ;;  %2130 = vmatprep.subr.bf16.mxu0 %v3336_v12  ;;  %v3415_v11 = vld [vmem:[#allocation5 + $0x720] ss:$16 sps:$4 sm:$0xff]   ;;  %v3420_v12 = vld [vmem:[#allocation5 + $0x504] ss:$16 sps:$4 sm:$0xff]  }
  0x84   :  { %2171 = vmatprep.subr.bf16.mxu1 %v3339_v13  ;;  %2160 = vmatprep.mubr.bf16.mxu0 %v3939_v37  ;;  %v3423_v13 = vld [vmem:[#allocation5 + $0x704] ss:$16 sps:$4 sm:$0xff]  }
  0x85   :  { %2201 = vmatprep.mubr.bf16.mxu1 %v3941_v40 }
  0x86   :  { %2131 = vmatpush1.bf16.msra.mxu0 %v3334_v14  ;;  %v3418_v14 = vld [vmem:[#allocation5 + $0x500] ss:$16 sps:$4 sm:$0xff]  }
  0x87   :  { %2172 = vmatpush1.bf16.msra.mxu1 %v3337_v15  ;;  %2132 = vmatprep.subr.bf16.mxu0 %v3342_v16  ;;  %v3421_v15 = vld [vmem:[#allocation5 + $0x700] ss:$16 sps:$4 sm:$0xff]  }
  0x88   :  { %2173 = vmatprep.subr.bf16.mxu1 %v3345_v17  ;;  %v88_v16 = vld [vmem:[#allocation2 + $0x20] sm:$0xff]  ;;  %v90_v17 = vld [vmem:[#allocation2 + $0x30] sm:$0xff] }
  0x8a   :  { %2133 = vmatpush1.bf16.msra.mxu0 %v3340_v18  ;;  %v3426_v18 = vld [vmem:[#allocation5 + $0x8e4] ss:$16 sps:$4 sm:$0xff]  }
  0x8b   :  { %2174 = vmatpush1.bf16.msra.mxu1 %v3343_v19  ;;  %2134 = vmatprep.subr.bf16.mxu0 %v3348_v20  ;;  %v3429_v19 = vld [vmem:[#allocation5 + $0xec] ss:$16 sps:$4 sm:$0xff]   ;;  %v3945_v20 = vpack.c.bf16 %v88_v16, %v88_v16 }
  0x8c   :  { %2175 = vmatprep.subr.bf16.mxu1 %v3351_v21  ;;  %v3947_v21 = vpack.c.bf16 %v90_v17, %v90_v17  ;;  %v3507_v16 = vld [vmem:[#allocation5 + $0x14c] ss:$16 sps:$4 sm:$0xff]   ;;  %v3502_v17 = vld [vmem:[#allocation5 + $0x940] ss:$16 sps:$4 sm:$0xff]  }
  0x8e   :  { %2135 = vmatpush1.bf16.msra.mxu0 %v3346_v22  ;;  %v3424_v22 = vld [vmem:[#allocation5 + $0x8e0] ss:$16 sps:$4 sm:$0xff]  }
  0x8f   :  { %2176 = vmatpush1.bf16.msra.mxu1 %v3349_v23  ;;  %2136 = vmatprep.subr.bf16.mxu0 %v3354_v24  ;;  %v3427_v23 = vld [vmem:[#allocation5 + $0xe8] ss:$16 sps:$4 sm:$0xff]   ;;  %v3432_v24 = vld [vmem:[#allocation5 + $0x8c4] ss:$16 sps:$4 sm:$0xff]  }
  0x90   :  { %2177 = vmatprep.subr.bf16.mxu1 %v3357_v25  ;;  %v3435_v25 = vld [vmem:[#allocation5 + $0xcc] ss:$16 sps:$4 sm:$0xff]  }
  0x92   :  { %2137 = vmatpush1.bf16.msra.mxu0 %v3352_v26  ;;  %v93_v26 = vld [vmem:[#allocation2 + $0x48] sm:$0xff] }
  0x93   :  { %2178 = vmatpush1.bf16.msra.mxu1 %v3355_v27  ;;  %2138 = vmatprep.subr.bf16.mxu0 %v3360_v28  ;;  %v3951_v27 = vpack.c.bf16 %v93_v26, %v93_v26  ;;  %v3430_v28 = vld [vmem:[#allocation5 + $0x8c0] ss:$16 sps:$4 sm:$0xff]   ;;  %v3519_v26 = vld [vmem:[#allocation5 + $0x10c] ss:$16 sps:$4 sm:$0xff]  }
  0x94   :  { %2179 = vmatprep.subr.bf16.mxu1 %v3363_v29  ;;  %v3433_v29 = vld [vmem:[#allocation5 + $0xc8] ss:$16 sps:$4 sm:$0xff]  }
  0x96   :  { %2139 = vmatpush1.bf16.msra.mxu0 %v3358_v30  ;;  %v3438_v30 = vld [vmem:[#allocation5 + $0x8a4] ss:$16 sps:$4 sm:$0xff]  }
  0x97   :  { %2180 = vmatpush1.bf16.msra.mxu1 %v3361_v31  ;;  %2140 = vmatprep.subr.bf16.mxu0 %v3366_v32  ;;  %v3441_v31 = vld [vmem:[#allocation5 + $0xac] ss:$16 sps:$4 sm:$0xff]   ;;  %v3436_v32 = vld [vmem:[#allocation5 + $0x8a0] ss:$16 sps:$4 sm:$0xff]  }
  0x98   :  { %2181 = vmatprep.subr.bf16.mxu1 %v3369_v33  ;;  %v3439_v33 = vld [vmem:[#allocation5 + $0xa8] ss:$16 sps:$4 sm:$0xff]  }
  0x9a   :  { %2141 = vmatpush1.bf16.msra.mxu0 %v3364_v35  ;;  %v3447_v35 = vld [vmem:[#allocation5 + $0x8c] ss:$16 sps:$4 sm:$0xff]  }
  0x9b   :  { %2182 = vmatpush1.bf16.msra.mxu1 %v3367_v36  ;;  %2142 = vmatprep.subr.bf16.mxu0 %v3372_v39  ;;  %v3442_v36 = vld [vmem:[#allocation5 + $0x880] ss:$16 sps:$4 sm:$0xff]   ;;  %v3450_v39 = vld [vmem:[#allocation5 + $0x864] ss:$16 sps:$4 sm:$0xff]  }
  0x9c   :  { %2183 = vmatprep.subr.bf16.mxu1 %v3375_v41  ;;  %v3453_v41 = vld [vmem:[#allocation5 + $0x6c] ss:$16 sps:$4 sm:$0xff]  }
  0x9e   :  { %2143 = vmatpush1.bf16.msra.mxu0 %v3370_v42  ;;  %v3448_v42 = vld [vmem:[#allocation5 + $0x860] ss:$16 sps:$4 sm:$0xff]  }
  0x9f   :  { %2184 = vmatpush1.bf16.msra.mxu1 %v3373_v43  ;;  %2144 = vmatprep.subr.bf16.mxu0 %v3378_v44  ;;  %v3456_v43 = vld [vmem:[#allocation5 + $0x844] ss:$16 sps:$4 sm:$0xff]   ;;  %v3459_v44 = vld [vmem:[#allocation5 + $0x4c] ss:$16 sps:$4 sm:$0xff]  }
  0xa0   :  { %2185 = vmatprep.subr.bf16.mxu1 %v3381_v45  ;;  %v3454_v45 = vld [vmem:[#allocation5 + $0x840] ss:$16 sps:$4 sm:$0xff]  }
  0xa2   :  { %2145 = vmatpush2.bf16.msra.mxu0 %v3376_v46  ;;  %v3457_v46 = vld [vmem:[#allocation5 + $0x48] ss:$16 sps:$4 sm:$0xff]  }
  0xa3   :  { %2186 = vmatpush2.bf16.msra.mxu1 %v3379_v47  ;;  %2146 = vmatprep.subr.bf16.mxu0 %v3384_v48  ;;  %v3462_v47 = vld [vmem:[#allocation5 + $0x824] ss:$16 sps:$4 sm:$0xff]   ;;  %v3465_v48 = vld [vmem:[#allocation5 + $0x2c] ss:$16 sps:$4 sm:$0xff]  }
  0xa4   :  { %2187 = vmatprep.subr.bf16.mxu1 %v3387_v50  ;;  %v3460_v50 = vld [vmem:[#allocation5 + $0x820] ss:$16 sps:$4 sm:$0xff]  }
  0xa6   :  { %2147 = vmatpush2.bf16.msra.mxu0 %v3382_v51  ;;  %v3463_v51 = vld [vmem:[#allocation5 + $0x28] ss:$16 sps:$4 sm:$0xff]  }
  0xa7   :  { %2188 = vmatpush2.bf16.msra.mxu1 %v3385_v53  ;;  %2148 = vmatprep.subr.bf16.mxu0 %v3390_v54  ;;  %v3468_v53 = vld [vmem:[#allocation5 + $0x804] ss:$16 sps:$4 sm:$0xff]   ;;  %v3471_v54 = vld [vmem:[#allocation5 + $0xc] ss:$16 sps:$4 sm:$0xff]  }
  0xa8   :  { %2189 = vmatprep.subr.bf16.mxu1 %v3393_v55  ;;  %v3466_v55 = vld [vmem:[#allocation5 + $0x800] ss:$16 sps:$4 sm:$0xff]  }
  0xaa   :  { %2149 = vmatpush2.bf16.msra.mxu0 %v3388_v56  ;;  %v3469_v56 = vld [vmem:[#allocation5 + $0x8] ss:$16 sps:$4 sm:$0xff]  }
  0xab   :  { %2190 = vmatpush2.bf16.msra.mxu1 %v3391_v57  ;;  %2150 = vmatprep.subr.bf16.mxu0 %v3396_v58  ;;  %v3474_v57 = vld [vmem:[#allocation5 + $0x9e4] ss:$16 sps:$4 sm:$0xff]   ;;  %v3477_v58 = vld [vmem:[#allocation5 + $0x1ec] ss:$16 sps:$4 sm:$0xff]  }
  0xac   :  { %2191 = vmatprep.subr.bf16.mxu1 %v3399_v59  ;;  %v3472_v59 = vld [vmem:[#allocation5 + $0x9e0] ss:$16 sps:$4 sm:$0xff]  }
  0xae   :  { %2151 = vmatpush2.bf16.msra.mxu0 %v3394_v60  ;;  %v3475_v60 = vld [vmem:[#allocation5 + $0x1e8] ss:$16 sps:$4 sm:$0xff]  }
  0xaf   :  { %2192 = vmatpush2.bf16.msra.mxu1 %v3397_v61  ;;  %2152 = vmatprep.subr.bf16.mxu0 %v3402_v62  ;;  %v3480_v61 = vld [vmem:[#allocation5 + $0x9c4] ss:$16 sps:$4 sm:$0xff]   ;;  %v3483_v62 = vld [vmem:[#allocation5 + $0x1cc] ss:$16 sps:$4 sm:$0xff]  }
  0xb0   :  { %2193 = vmatprep.subr.bf16.mxu1 %v3405_v63  ;;  %v3478_v63 = vld [vmem:[#allocation5 + $0x9c0] ss:$16 sps:$4 sm:$0xff]  }
  0xb2   :  { %2153 = vmatpush2.bf16.msra.mxu0 %v3400_v0  ;;  %v3481_v0 = vld [vmem:[#allocation5 + $0x1c8] ss:$16 sps:$4 sm:$0xff]  }
  0xb3   :  { %2194 = vmatpush2.bf16.msra.mxu1 %v3403_v1  ;;  %2154 = vmatprep.subr.bf16.mxu0 %v3408_v2  ;;  %v3486_v1 = vld [vmem:[#allocation5 + $0x9a4] ss:$16 sps:$4 sm:$0xff]   ;;  %v3489_v2 = vld [vmem:[#allocation5 + $0x1ac] ss:$16 sps:$4 sm:$0xff]  }
  0xb4   :  { %2195 = vmatprep.subr.bf16.mxu1 %v3411_v3  ;;  %v3484_v3 = vld [vmem:[#allocation5 + $0x9a0] ss:$16 sps:$4 sm:$0xff]  }
  0xb6   :  { %2155 = vmatpush2.bf16.msra.mxu0 %v3406_v4  ;;  %v3487_v4 = vld [vmem:[#allocation5 + $0x1a8] ss:$16 sps:$4 sm:$0xff]  }
  0xb7   :  { %2196 = vmatpush2.bf16.msra.mxu1 %v3409_v5  ;;  %2156 = vmatprep.subr.bf16.mxu0 %v3414_v6  ;;  %v3492_v5 = vld [vmem:[#allocation5 + $0x984] ss:$16 sps:$4 sm:$0xff]   ;;  %v3495_v6 = vld [vmem:[#allocation5 + $0x18c] ss:$16 sps:$4 sm:$0xff]  }
  0xb8   :  { %2197 = vmatprep.subr.bf16.mxu1 %v3417_v7  ;;  %v3490_v7 = vld [vmem:[#allocation5 + $0x980] ss:$16 sps:$4 sm:$0xff]  }
  0xba   :  { %2157 = vmatpush2.bf16.msra.mxu0 %v3412_v10  ;;  %v3493_v10 = vld [vmem:[#allocation5 + $0x188] ss:$16 sps:$4 sm:$0xff]  }
  0xbb   :  { %2198 = vmatpush2.bf16.msra.mxu1 %v3415_v11  ;;  %2158 = vmatprep.subr.bf16.mxu0 %v3420_v12  ;;  %v3498_v11 = vld [vmem:[#allocation5 + $0x964] ss:$16 sps:$4 sm:$0xff]   ;;  %v3501_v12 = vld [vmem:[#allocation5 + $0x16c] ss:$16 sps:$4 sm:$0xff]  }
  0xbc   :  { %2199 = vmatprep.subr.bf16.mxu1 %v3423_v13  ;;  %v3496_v13 = vld [vmem:[#allocation5 + $0x960] ss:$16 sps:$4 sm:$0xff]  }
  0xbe   :  { %2159 = vmatpush2.bf16.msra.mxu0 %v3418_v14  ;;  %v3499_v14 = vld [vmem:[#allocation5 + $0x168] ss:$16 sps:$4 sm:$0xff]  }
  0xbf   :  { %2200 = vmatpush2.bf16.msra.mxu1 %v3421_v15  ;;  %2210 = vmatprep.subr.bf16.mxu0 %v3426_v18  ;;  %v3504_v15 = vld [vmem:[#allocation5 + $0x944] ss:$16 sps:$4 sm:$0xff]   ;;  %v3505_v18 = vld [vmem:[#allocation5 + $0x148] ss:$16 sps:$4 sm:$0xff]  }
  0xc0   :  { %2251 = vmatprep.subr.bf16.mxu1 %v3429_v19  ;;  %v3510_v19 = vld [vmem:[#allocation5 + $0x924] ss:$16 sps:$4 sm:$0xff]  }
  0xc1   :  { %2161 = vmatmul.mubr.bf16.vlgmr.msra.gmra.mxu0 %v3945_v20 }
  0xc2   :  { %2202 = vmatmul.mubr.bf16.vlgmr.msra.gmra.mxu1 %v3947_v21  ;;  %2211 = vmatpush1.bf16.msra.mxu0 %v3424_v22  ;;  %v3513_v22 = vld [vmem:[#allocation5 + $0x12c] ss:$16 sps:$4 sm:$0xff]  }
  0xc3   :  { %2252 = vmatpush1.bf16.msra.mxu1 %v3427_v23  ;;  %2212 = vmatprep.subr.bf16.mxu0 %v3432_v24  ;;  %v3508_v23 = vld [vmem:[#allocation5 + $0x920] ss:$16 sps:$4 sm:$0xff]   ;;  %v3511_v24 = vld [vmem:[#allocation5 + $0x128] ss:$16 sps:$4 sm:$0xff]  }
  0xc4   :  { %2253 = vmatprep.subr.bf16.mxu1 %v3435_v25  ;;  %2242 = vmatprep.mubr.bf16.mxu0 %v3951_v27  ;;  %v3516_v25 = vld [vmem:[#allocation5 + $0x904] ss:$16 sps:$4 sm:$0xff]  }
  0xc5   :  { %2283 = vmatprep.mubr.bf16.mxu1 %v3927_v49  ;;  %v3451_v49 = vld [vmem:[#allocation5 + $0x68] ss:$16 sps:$4 sm:$0xff]  }
  0xc6   :  { %2213 = vmatpush1.bf16.msra.mxu0 %v3430_v28  ;;  %v3514_v28 = vld [vmem:[#allocation5 + $0x900] ss:$16 sps:$4 sm:$0xff]  }
  0xc7   :  { %2254 = vmatpush1.bf16.msra.mxu1 %v3433_v29  ;;  %2214 = vmatprep.subr.bf16.mxu0 %v3438_v30  ;;  %v3517_v29 = vld [vmem:[#allocation5 + $0x108] ss:$16 sps:$4 sm:$0xff]   ;;  %v92_v30 = vld [vmem:[#allocation2 + $0x40] sm:$0xff] }
  0xc8   :  { %2255 = vmatprep.subr.bf16.mxu1 %v3441_v31  ;;  %v3522_v31 = vld [vmem:[#allocation5 + $0x2ec] ss:$16 sps:$4 sm:$0xff]  }
  0xca   :  { %2215 = vmatpush1.bf16.msra.mxu0 %v3436_v32  ;;  %v3525_v32 = vld [vmem:[#allocation5 + $0x4ec] ss:$16 sps:$4 sm:$0xff]  }
  0xcb   :  { %2256 = vmatpush1.bf16.msra.mxu1 %v3439_v33  ;;  %2216 = vmatprep.subr.bf16.mxu0 %v3444_v34  ;;  %v3955_v33 = vpack.c.bf16 %v92_v30, %v92_v30  ;;  %v3520_v34 = vld [vmem:[#allocation5 + $0x2e8] ss:$16 sps:$4 sm:$0xff]   ;;  %v3606_v30 = vld [vmem:[#allocation5 + $0x32c] ss:$16 sps:$4 sm:$0xff]  }
  0xcc   :  { %2257 = vmatprep.subr.bf16.mxu1 %v3447_v35  ;;  %v3523_v35 = vld [vmem:[#allocation5 + $0x4e8] ss:$16 sps:$4 sm:$0xff]  }
  0xce   :  { %2217 = vmatpush1.bf16.msra.mxu0 %v3442_v36  ;;  %v3528_v36 = vld [vmem:[#allocation5 + $0x2cc] ss:$16 sps:$4 sm:$0xff]  }
  0xcf   :  { %2258 = vmatpush1.bf16.msra.mxu1 %v3445_v38  ;;  %2218 = vmatprep.subr.bf16.mxu0 %v3450_v39  ;;  %v3531_v38 = vld [vmem:[#allocation5 + $0x4cc] ss:$16 sps:$4 sm:$0xff]   ;;  %v3526_v39 = vld [vmem:[#allocation5 + $0x2c8] ss:$16 sps:$4 sm:$0xff]  }
  0xd0   :  { %2259 = vmatprep.subr.bf16.mxu1 %v3453_v41  ;;  %v3529_v41 = vld [vmem:[#allocation5 + $0x4c8] ss:$16 sps:$4 sm:$0xff]  }
  0xd2   :  { %2219 = vmatpush1.bf16.msra.mxu0 %v3448_v42  ;;  %v3534_v42 = vld [vmem:[#allocation5 + $0x2ac] ss:$16 sps:$4 sm:$0xff]  }
  0xd3   :  { %2260 = vmatpush1.bf16.msra.mxu1 %v3451_v49  ;;  %2220 = vmatprep.subr.bf16.mxu0 %v3456_v43  ;;  %v3537_v49 = vld [vmem:[#allocation5 + $0x4ac] ss:$16 sps:$4 sm:$0xff]   ;;  %v3532_v43 = vld [vmem:[#allocation5 + $0x2a8] ss:$16 sps:$4 sm:$0xff]  }
  0xd4   :  { %2261 = vmatprep.subr.bf16.mxu1 %v3459_v44  ;;  %v3535_v44 = vld [vmem:[#allocation5 + $0x4a8] ss:$16 sps:$4 sm:$0xff]  }
  0xd6   :  { %2221 = vmatpush1.bf16.msra.mxu0 %v3454_v45  ;;  %v3540_v45 = vld [vmem:[#allocation5 + $0x28c] ss:$16 sps:$4 sm:$0xff]  }
  0xd7   :  { %2262 = vmatpush1.bf16.msra.mxu1 %v3457_v46  ;;  %2222 = vmatprep.subr.bf16.mxu0 %v3462_v47  ;;  %v3538_v46 = vld [vmem:[#allocation5 + $0x288] ss:$16 sps:$4 sm:$0xff]  }
  0xd8   :  { %2263 = vmatprep.subr.bf16.mxu1 %v3465_v48  ;;  %v3541_v47 = vld [vmem:[#allocation5 + $0x488] ss:$16 sps:$4 sm:$0xff]   ;;  %v3546_v48 = vld [vmem:[#allocation5 + $0x26c] ss:$16 sps:$4 sm:$0xff]  }
  0xda   :  { %2223 = vmatpush1.bf16.msra.mxu0 %v3460_v50  ;;  %v3549_v50 = vld [vmem:[#allocation5 + $0x46c] ss:$16 sps:$4 sm:$0xff]  }
  0xdb   :  { %2264 = vmatpush1.bf16.msra.mxu1 %v3463_v51  ;;  %2224 = vmatprep.subr.bf16.mxu0 %v3468_v53  ;;  %v3544_v51 = vld [vmem:[#allocation5 + $0x268] ss:$16 sps:$4 sm:$0xff]   ;;  %v3555_v53 = vld [vmem:[#allocation5 + $0x44c] ss:$16 sps:$4 sm:$0xff]  }
  0xdc   :  { %2265 = vmatprep.subr.bf16.mxu1 %v3471_v54  ;;  %v3550_v54 = vld [vmem:[#allocation5 + $0x248] ss:$16 sps:$4 sm:$0xff]  }
  0xde   :  { %2225 = vmatpush1.bf16.msra.mxu0 %v3466_v55  ;;  %v3553_v55 = vld [vmem:[#allocation5 + $0x448] ss:$16 sps:$4 sm:$0xff]  }
  0xdf   :  { %2266 = vmatpush1.bf16.msra.mxu1 %v3469_v56  ;;  %2226 = vmatprep.subr.bf16.mxu0 %v3474_v57  ;;  %v3558_v56 = vld [vmem:[#allocation5 + $0x22c] ss:$16 sps:$4 sm:$0xff]  }
  0xe0   :  { %2267 = vmatprep.subr.bf16.mxu1 %v3477_v58  ;;  %v3561_v57 = vld [vmem:[#allocation5 + $0x42c] ss:$16 sps:$4 sm:$0xff]   ;;  %v3556_v58 = vld [vmem:[#allocation5 + $0x228] ss:$16 sps:$4 sm:$0xff]  }
  0xe2   :  { %2227 = vmatpush2.bf16.msra.mxu0 %v3472_v59  ;;  %v3559_v59 = vld [vmem:[#allocation5 + $0x428] ss:$16 sps:$4 sm:$0xff]  }
  0xe3   :  { %2268 = vmatpush2.bf16.msra.mxu1 %v3475_v60  ;;  %2228 = vmatprep.subr.bf16.mxu0 %v3480_v61  ;;  %v3564_v60 = vld [vmem:[#allocation5 + $0x20c] ss:$16 sps:$4 sm:$0xff]  }
  0xe4   :  { %2269 = vmatprep.subr.bf16.mxu1 %v3483_v62  ;;  %v3567_v61 = vld [vmem:[#allocation5 + $0x40c] ss:$16 sps:$4 sm:$0xff]   ;;  %v3562_v62 = vld [vmem:[#allocation5 + $0x208] ss:$16 sps:$4 sm:$0xff]  }
  0xe6   :  { %2229 = vmatpush2.bf16.msra.mxu0 %v3478_v63  ;;  %v3565_v63 = vld [vmem:[#allocation5 + $0x408] ss:$16 sps:$4 sm:$0xff]  }
  0xe7   :  { %2270 = vmatpush2.bf16.msra.mxu1 %v3481_v0  ;;  %2230 = vmatprep.subr.bf16.mxu0 %v3486_v1  ;;  %v3570_v0 = vld [vmem:[#allocation5 + $0x3ec] ss:$16 sps:$4 sm:$0xff]  }
  0xe8   :  { %2271 = vmatprep.subr.bf16.mxu1 %v3489_v2  ;;  %v3573_v1 = vld [vmem:[#allocation5 + $0x5ec] ss:$16 sps:$4 sm:$0xff]   ;;  %v3568_v2 = vld [vmem:[#allocation5 + $0x3e8] ss:$16 sps:$4 sm:$0xff]  }
  0xea   :  { %2231 = vmatpush2.bf16.msra.mxu0 %v3484_v3  ;;  %v3571_v3 = vld [vmem:[#allocation5 + $0x5e8] ss:$16 sps:$4 sm:$0xff]  }
  0xeb   :  { %2272 = vmatpush2.bf16.msra.mxu1 %v3487_v4  ;;  %2232 = vmatprep.subr.bf16.mxu0 %v3492_v5  ;;  %v3576_v4 = vld [vmem:[#allocation5 + $0x3cc] ss:$16 sps:$4 sm:$0xff]  }
  0xec   :  { %2273 = vmatprep.subr.bf16.mxu1 %v3495_v6  ;;  %v3579_v5 = vld [vmem:[#allocation5 + $0x5cc] ss:$16 sps:$4 sm:$0xff]   ;;  %v3574_v6 = vld [vmem:[#allocation5 + $0x3c8] ss:$16 sps:$4 sm:$0xff]  }
  0xee   :  { %2233 = vmatpush2.bf16.msra.mxu0 %v3490_v7  ;;  %v3577_v7 = vld [vmem:[#allocation5 + $0x5c8] ss:$16 sps:$4 sm:$0xff]  }
  0xef   :  { %2274 = vmatpush2.bf16.msra.mxu1 %v3493_v10  ;;  %2234 = vmatprep.subr.bf16.mxu0 %v3498_v11  ;;  %v3582_v10 = vld [vmem:[#allocation5 + $0x3ac] ss:$16 sps:$4 sm:$0xff]  }
  0xf0   :  { %2275 = vmatprep.subr.bf16.mxu1 %v3501_v12  ;;  %v3585_v11 = vld [vmem:[#allocation5 + $0x5ac] ss:$16 sps:$4 sm:$0xff]   ;;  %v3580_v12 = vld [vmem:[#allocation5 + $0x3a8] ss:$16 sps:$4 sm:$0xff]  }
  0xf2   :  { %2235 = vmatpush2.bf16.msra.mxu0 %v3496_v13  ;;  %v3583_v13 = vld [vmem:[#allocation5 + $0x5a8] ss:$16 sps:$4 sm:$0xff]  }
  0xf3   :  { %2276 = vmatpush2.bf16.msra.mxu1 %v3499_v14  ;;  %2236 = vmatprep.subr.bf16.mxu0 %v3504_v15  ;;  %v3588_v14 = vld [vmem:[#allocation5 + $0x38c] ss:$16 sps:$4 sm:$0xff]  }
  0xf4   :  { %2277 = vmatprep.subr.bf16.mxu1 %v3507_v16  ;;  %v3591_v15 = vld [vmem:[#allocation5 + $0x58c] ss:$16 sps:$4 sm:$0xff]   ;;  %v3586_v16 = vld [vmem:[#allocation5 + $0x388] ss:$16 sps:$4 sm:$0xff]  }
  0xf6   :  { %2237 = vmatpush2.bf16.msra.mxu0 %v3502_v17  ;;  %v3589_v17 = vld [vmem:[#allocation5 + $0x588] ss:$16 sps:$4 sm:$0xff]  }
  0xf7   :  { %2278 = vmatpush2.bf16.msra.mxu1 %v3505_v18  ;;  %2238 = vmatprep.subr.bf16.mxu0 %v3510_v19  ;;  %v3594_v18 = vld [vmem:[#allocation5 + $0x36c] ss:$16 sps:$4 sm:$0xff]  }
  0xf8   :  { %2279 = vmatprep.subr.bf16.mxu1 %v3513_v22  ;;  %v3597_v19 = vld [vmem:[#allocation5 + $0x56c] ss:$16 sps:$4 sm:$0xff]   ;;  %v3592_v22 = vld [vmem:[#allocation5 + $0x368] ss:$16 sps:$4 sm:$0xff]  }
  0xfa   :  { %2239 = vmatpush2.bf16.msra.mxu0 %v3508_v23  ;;  %v3595_v23 = vld [vmem:[#allocation5 + $0x568] ss:$16 sps:$4 sm:$0xff]  }
  0xfb   :  { %2280 = vmatpush2.bf16.msra.mxu1 %v3511_v24  ;;  %2240 = vmatprep.subr.bf16.mxu0 %v3516_v25  ;;  %v3600_v24 = vld [vmem:[#allocation5 + $0x34c] ss:$16 sps:$4 sm:$0xff]  }
  0xfc   :  { %2281 = vmatprep.subr.bf16.mxu1 %v3519_v26  ;;  %v3603_v25 = vld [vmem:[#allocation5 + $0x54c] ss:$16 sps:$4 sm:$0xff]   ;;  %v3598_v26 = vld [vmem:[#allocation5 + $0x348] ss:$16 sps:$4 sm:$0xff]  }
  0xfe   :  { %2241 = vmatpush2.bf16.msra.mxu0 %v3514_v28  ;;  %v3601_v28 = vld [vmem:[#allocation5 + $0x548] ss:$16 sps:$4 sm:$0xff]  }
  0xff   :  { %2282 = vmatpush2.bf16.msra.mxu1 %v3517_v29  ;;  %2292 = vmatprep.subr.bf16.mxu0 %v3522_v31  ;;  %v426_v29 = vlaneseq  ;;  %v3609_v31 = vld [vmem:[#allocation5 + $0x52c] ss:$16 sps:$4 sm:$0xff]  }
 0x100   :  { %2333 = vmatprep.subr.bf16.mxu1 %v3525_v32  ;;  %v3604_v32 = vld [vmem:[#allocation5 + $0x328] ss:$16 sps:$4 sm:$0xff]  }
 0x101   :  { %2243 = vmatmul.mubr.bf16.vlgmr.msra.gmra.mxu0 %v3955_v33 }
 0x102   :  { %2284 = vmatmul.mubr.bf16.vlgmr.msra.gmra.mxu1 %v3933_v8  ;;  %2293 = vmatpush1.bf16.msra.mxu0 %v3520_v34  ;;  %v3543_v8 = vld [vmem:[#allocation5 + $0x48c] ss:$16 sps:$4 sm:$0xff]   ;;  %v3607_v34 = vld [vmem:[#allocation5 + $0x528] ss:$16 sps:$4 sm:$0xff]  }
 0x103   :  { %2334 = vmatpush1.bf16.msra.mxu1 %v3523_v35  ;;  %2294 = vmatprep.subr.bf16.mxu0 %v3528_v36  ;;  %v3961_v35 = vshrl.u32 %v426_v29, 7  ;;  %v3612_v36 = vld [vmem:[#allocation5 + $0x30c] ss:$16 sps:$4 sm:$0xff]   ;;  %v3667_v29 = vld [vmem:[#allocation5 + $0x9e8] ss:$16 sps:$4 sm:$0xff]  }
 0x104   :  { %2335 = vmatprep.subr.bf16.mxu1 %v3531_v38  ;;  %2324 = vmatprep.mubr.bf16.mxu0 %v3929_v52  ;;  %v3547_v52 = vld [vmem:[#allocation5 + $0x468] ss:$16 sps:$4 sm:$0xff]   ;;  %v3615_v38 = vld [vmem:[#allocation5 + $0x50c] ss:$16 sps:$4 sm:$0xff]  }
 0x105   :  { %2365 = vmatprep.mubr.bf16.mxu1 %v3939_v37  ;;  %v3552_v37 = vld [vmem:[#allocation5 + $0x24c] ss:$16 sps:$4 sm:$0xff]  }
 0x106   :  { %2295 = vmatpush1.bf16.msra.mxu0 %v3526_v39  ;;  %v3610_v39 = vld [vmem:[#allocation5 + $0x308] ss:$16 sps:$4 sm:$0xff]  }
 0x107   :  { %2336 = vmatpush1.bf16.msra.mxu1 %v3529_v41  ;;  %2296 = vmatprep.subr.bf16.mxu0 %v3534_v42  ;;  %v3613_v41 = vld [vmem:[#allocation5 + $0x508] ss:$16 sps:$4 sm:$0xff]   ;;  %v428_v42 = vsub.s32 0, %v3961_v35 }
 0x108   :  { %2337 = vmatprep.subr.bf16.mxu1 %v3537_v49  ;;  %v3964_v49 = vld [vmem:[#allocation7] sm:$0xf] }
 0x10a   :  { %2297 = vmatpush1.bf16.msra.mxu0 %v3532_v43  ;;  %v3618_v43 = vld [vmem:[#allocation5 + $0x6ec] ss:$16 sps:$4 sm:$0xff]  }
 0x10b   :  { %2338 = vmatpush1.bf16.msra.mxu1 %v3535_v44  ;;  %2298 = vmatprep.subr.bf16.mxu0 %v3540_v45  ;;  %v3621_v44 = vld [vmem:[#allocation5 + $0x8ec] ss:$16 sps:$4 sm:$0xff]   ;;  %v432_v45 = vsub.s32 1, %v3961_v35 }
 0x10c   :  { %2339 = vmatprep.subr.bf16.mxu1 %v3543_v8  ;;  %v429_v8 = vrot.slane %v3964_v49, %v428_v42  ;;  %v3684_v42 = vld [vmem:[#allocation5 + $0x78c] ss:$16 sps:$4 sm:$0xff]  }
 0x10e   :  { %2299 = vmatpush1.bf16.msra.mxu0 %v3538_v46  ;;  %v3616_v46 = vld [vmem:[#allocation5 + $0x6e8] ss:$16 sps:$4 sm:$0xff]  }
 0x10f   :  { %2340 = vmatpush1.bf16.msra.mxu1 %v3541_v47  ;;  %2300 = vmatprep.subr.bf16.mxu0 %v3546_v48  ;;  %v3619_v47 = vld [vmem:[#allocation5 + $0x8e8] ss:$16 sps:$4 sm:$0xff]   ;;  %v3624_v48 = vld [vmem:[#allocation5 + $0x6cc] ss:$16 sps:$4 sm:$0xff]  }
 0x110   :  { %2341 = vmatprep.subr.bf16.mxu1 %v3549_v50  ;;  %v3627_v50 = vld [vmem:[#allocation5 + $0x8cc] ss:$16 sps:$4 sm:$0xff]  }
 0x112   :  { %2301 = vmatpush1.bf16.msra.mxu0 %v3544_v51  ;;  %v433_v51 = vrot.slane %v3964_v49, %v432_v45  ;;  %v3685_v45 = vld [vmem:[#allocation5 + $0x988] ss:$16 sps:$4 sm:$0xff]  }
 0x113   :  { %2342 = vmatpush1.bf16.msra.mxu1 %v3547_v52  ;;  %2302 = vmatprep.subr.bf16.mxu0 %v3552_v37 }
 0x114   :  { %2343 = vmatprep.subr.bf16.mxu1 %v3555_v53 }
 0x116   :  { %2303 = vmatpush1.bf16.msra.mxu0 %v3550_v54  ;;  %v3622_v54 = vld [vmem:[#allocation5 + $0x6c8] ss:$16 sps:$4 sm:$0xff]  }
 0x117   :  { %2344 = vmatpush1.bf16.msra.mxu1 %v3553_v55  ;;  %2304 = vmatprep.subr.bf16.mxu0 %v3558_v56  ;;  %v3625_v55 = vld [vmem:[#allocation5 + $0x8c8] ss:$16 sps:$4 sm:$0xff]  }
 0x118   :  { %2345 = vmatprep.subr.bf16.mxu1 %v3561_v57 }
 0x11a   :  { %2305 = vmatpush1.bf16.msra.mxu0 %v3556_v58  ;;  %v3630_v58 = vld [vmem:[#allocation5 + $0x6ac] ss:$16 sps:$4 sm:$0xff]  }
 0x11b   :  { %2346 = vmatpush1.bf16.msra.mxu1 %v3559_v59  ;;  %2306 = vmatprep.subr.bf16.mxu0 %v3564_v60  ;;  %v3633_v59 = vld [vmem:[#allocation5 + $0x8ac] ss:$16 sps:$4 sm:$0xff]  }
 0x11c   :  { %2347 = vmatprep.subr.bf16.mxu1 %v3567_v61 }
 0x11e   :  { %2307 = vmatpush1.bf16.msra.mxu0 %v3562_v62 }
 0x11f   :  { %2348 = vmatpush1.bf16.msra.mxu1 %v3565_v63  ;;  %2308 = vmatprep.subr.bf16.mxu0 %v3570_v0  ;;  %v3628_v63 = vld [vmem:[#allocation5 + $0x6a8] ss:$16 sps:$4 sm:$0xff]  }
 0x120   :  { %2349 = vmatprep.subr.bf16.mxu1 %v3573_v1  ;;  %v3631_v0 = vld [vmem:[#allocation5 + $0x8a8] ss:$16 sps:$4 sm:$0xff]  }
 0x122   :  { %2309 = vmatpush2.bf16.msra.mxu0 %v3568_v2 }
 0x123   :  { %2350 = vmatpush2.bf16.msra.mxu1 %v3571_v3  ;;  %2310 = vmatprep.subr.bf16.mxu0 %v3576_v4  ;;  %v3636_v3 = vld [vmem:[#allocation5 + $0x68c] ss:$16 sps:$4 sm:$0xff]  }
 0x124   :  { %2351 = vmatprep.subr.bf16.mxu1 %v3579_v5  ;;  %v3639_v4 = vld [vmem:[#allocation5 + $0x88c] ss:$16 sps:$4 sm:$0xff]   ;;  %v3634_v5 = vld [vmem:[#allocation5 + $0x688] ss:$16 sps:$4 sm:$0xff]  }
 0x126   :  { %2311 = vmatpush2.bf16.msra.mxu0 %v3574_v6  ;;  %v3645_v6 = vld [vmem:[#allocation5 + $0x86c] ss:$16 sps:$4 sm:$0xff]  }
 0x127   :  { %2352 = vmatpush2.bf16.msra.mxu1 %v3577_v7  ;;  %2312 = vmatprep.subr.bf16.mxu0 %v3582_v10  ;;  %v3640_v7 = vld [vmem:[#allocation5 + $0x668] ss:$16 sps:$4 sm:$0xff]  }
 0x128   :  { %2353 = vmatprep.subr.bf16.mxu1 %v3585_v11  ;;  %v3643_v10 = vld [vmem:[#allocation5 + $0x868] ss:$16 sps:$4 sm:$0xff]   ;;  %v3648_v11 = vld [vmem:[#allocation5 + $0x64c] ss:$16 sps:$4 sm:$0xff]  }
 0x12a   :  { %2313 = vmatpush2.bf16.msra.mxu0 %v3580_v12  ;;  %v3651_v12 = vld [vmem:[#allocation5 + $0x84c] ss:$16 sps:$4 sm:$0xff]  }
 0x12b   :  { %2354 = vmatpush2.bf16.msra.mxu1 %v3583_v13  ;;  %2314 = vmatprep.subr.bf16.mxu0 %v3588_v14  ;;  %v3646_v13 = vld [vmem:[#allocation5 + $0x648] ss:$16 sps:$4 sm:$0xff]  }
 0x12c   :  { %2355 = vmatprep.subr.bf16.mxu1 %v3591_v15  ;;  %v3649_v14 = vld [vmem:[#allocation5 + $0x848] ss:$16 sps:$4 sm:$0xff]   ;;  %v3654_v15 = vld [vmem:[#allocation5 + $0x62c] ss:$16 sps:$4 sm:$0xff]  }
 0x12e   :  { %2315 = vmatpush2.bf16.msra.mxu0 %v3586_v16  ;;  %v3657_v16 = vld [vmem:[#allocation5 + $0x82c] ss:$16 sps:$4 sm:$0xff]  }
 0x12f   :  { %2356 = vmatpush2.bf16.msra.mxu1 %v3589_v17  ;;  %2316 = vmatprep.subr.bf16.mxu0 %v3594_v18  ;;  %v3652_v17 = vld [vmem:[#allocation5 + $0x628] ss:$16 sps:$4 sm:$0xff]  }
 0x130   :  { %2357 = vmatprep.subr.bf16.mxu1 %v3597_v19  ;;  %v3655_v18 = vld [vmem:[#allocation5 + $0x828] ss:$16 sps:$4 sm:$0xff]   ;;  %v3660_v19 = vld [vmem:[#allocation5 + $0x60c] ss:$16 sps:$4 sm:$0xff]  }
 0x132   :  { %2317 = vmatpush2.bf16.msra.mxu0 %v3592_v22  ;;  %v3663_v22 = vld [vmem:[#allocation5 + $0x80c] ss:$16 sps:$4 sm:$0xff]  }
 0x133   :  { %2358 = vmatpush2.bf16.msra.mxu1 %v3595_v23  ;;  %2318 = vmatprep.subr.bf16.mxu0 %v3600_v24  ;;  %v3658_v23 = vld [vmem:[#allocation5 + $0x608] ss:$16 sps:$4 sm:$0xff]  }
 0x134   :  { %2359 = vmatprep.subr.bf16.mxu1 %v3603_v25  ;;  %v3661_v24 = vld [vmem:[#allocation5 + $0x808] ss:$16 sps:$4 sm:$0xff]   ;;  %v3666_v25 = vld [vmem:[#allocation5 + $0x7ec] ss:$16 sps:$4 sm:$0xff]  }
 0x136   :  { %2319 = vmatpush2.bf16.msra.mxu0 %v3598_v26  ;;  %v3669_v26 = vld [vmem:[#allocation5 + $0x9ec] ss:$16 sps:$4 sm:$0xff]  }
 0x137   :  { %2360 = vmatpush2.bf16.msra.mxu1 %v3601_v28  ;;  %2320 = vmatprep.subr.bf16.mxu0 %v3606_v30  ;;  %v3664_v28 = vld [vmem:[#allocation5 + $0x7e8] ss:$16 sps:$4 sm:$0xff]   ;;  %v3672_v30 = vld [vmem:[#allocation5 + $0x7cc] ss:$16 sps:$4 sm:$0xff]  }
 0x138   :  { %2361 = vmatprep.subr.bf16.mxu1 %v3609_v31  ;;  %v3675_v31 = vld [vmem:[#allocation5 + $0x9cc] ss:$16 sps:$4 sm:$0xff]  }
 0x13a   :  { %2321 = vmatpush2.bf16.msra.mxu0 %v3604_v32  ;;  %v3670_v32 = vld [vmem:[#allocation5 + $0x7c8] ss:$16 sps:$4 sm:$0xff]  }
 0x13b   :  { %2362 = vmatpush2.bf16.msra.mxu1 %v3607_v34  ;;  %2322 = vmatprep.subr.bf16.mxu0 %v3612_v36  ;;  %v3673_v34 = vld [vmem:[#allocation5 + $0x9c8] ss:$16 sps:$4 sm:$0xff]   ;;  %v3678_v36 = vld [vmem:[#allocation5 + $0x7ac] ss:$16 sps:$4 sm:$0xff]  }
 0x13c   :  { %2363 = vmatprep.subr.bf16.mxu1 %v3615_v38  ;;  %v3681_v38 = vld [vmem:[#allocation5 + $0x9ac] ss:$16 sps:$4 sm:$0xff]  }
 0x13e   :  { %2323 = vmatpush2.bf16.msra.mxu0 %v3610_v39  ;;  %v3676_v39 = vld [vmem:[#allocation5 + $0x7a8] ss:$16 sps:$4 sm:$0xff]  }
 0x13f   :  { %2364 = vmatpush2.bf16.msra.mxu1 %v3613_v41  ;;  %2374 = vmatprep.subr.bf16.mxu0 %v3618_v43  ;;  %v3679_v41 = vld [vmem:[#allocation5 + $0x9a8] ss:$16 sps:$4 sm:$0xff]   ;;  %v3687_v43 = vld [vmem:[#allocation5 + $0x98c] ss:$16 sps:$4 sm:$0xff]  }
 0x140   :  { %2415 = vmatprep.subr.bf16.mxu1 %v3621_v44  ;;  %v3682_v44 = vld [vmem:[#allocation5 + $0x788] ss:$16 sps:$4 sm:$0xff]  }
 0x141   :  { %v2080_v52 = vpop.f32.mrf.mxu0  ;;  %2325 = vmatmul.mubr.bf16.vlgmr.msra.gmra.mxu0 %v3935_v9 }
 0x142   :  { %v2121_v37 = vpop.f32.mrf.mxu1  ;;  %2366 = vmatmul.mubr.bf16.vlgmr.msra.gmra.mxu1 %v3945_v20  ;;  %v2081_v53 = vadd.f32 %v2080_v52, %v429_v8  ;;  %2375 = vmatpush1.bf16.msra.mxu0 %v3616_v46  ;;  %v3690_v8 = vld [vmem:[#allocation5 + $0x76c] ss:$16 sps:$4 sm:$0xff]   ;;  %v3694_v52 = vld [vmem:[#allocation5 + $0x748] ss:$16 sps:$4 sm:$0xff]  }
 0x143   :  { %2416 = vmatpush1.bf16.msra.mxu1 %v3619_v47  ;;  %v2082_v56 = vpop.f32.mrf.mxu0  ;;  %2376 = vmatprep.subr.bf16.mxu0 %v3624_v48  ;;  %v3693_v46 = vld [vmem:[#allocation5 + $0x96c] ss:$16 sps:$4 sm:$0xff]   ;;  %v3688_v47 = vld [vmem:[#allocation5 + $0x768] ss:$16 sps:$4 sm:$0xff]  }
 0x144   :  { %v2123_v57 = vpop.f32.mrf.mxu1  ;;  %2417 = vmatprep.subr.bf16.mxu1 %v3627_v50  ;;  %v3971_v60 = vadd.f32 %v2121_v37, %v2081_v53  ;;  %v2083_v61 = vadd.f32 %v2082_v56, %v433_v51  ;;  %2406 = vmatprep.mubr.bf16.mxu0 %v3941_v40  ;;  %v3637_v40 = vld [vmem:[#allocation5 + $0x888] ss:$16 sps:$4 sm:$0xff]   ;;  %v3696_v50 = vld [vmem:[#allocation5 + $0x74c] ss:$16 sps:$4 sm:$0xff]  }
 0x145   :  { %2447 = vmatprep.mubr.bf16.mxu1 %v3951_v27  ;;  %v2084_v9 = vpop.f32.mrf.mxu0  ;;  %v3642_v27 = vld [vmem:[#allocation5 + $0x66c] ss:$16 sps:$4 sm:$0xff]   ;;  %v3691_v48 = vld [vmem:[#allocation5 + $0x968] ss:$16 sps:$4 sm:$0xff]  }
 0x146   :  { %v2125_v20 = vpop.f32.mrf.mxu1  ;;  %v3975_v62 = vadd.f32 %v2123_v57, %v2083_v61  ;;  %2377 = vmatpush1.bf16.msra.mxu0 %v3622_v54  ;;  %v3699_v51 = vld [vmem:[#allocation5 + $0x94c] ss:$16 sps:$4 sm:$0xff]   ;;  %v3697_v37 = vld [vmem:[#allocation5 + $0x948] ss:$16 sps:$4 sm:$0xff]  }
 0x147   :  { %2418 = vmatpush1.bf16.msra.mxu1 %v3625_v55  ;;  %v2085_v1 = vpop.f32.mrf.mxu0  ;;  %2378 = vmatprep.subr.bf16.mxu0 %v3630_v58  ;;  %v3702_v53 = vld [vmem:[#allocation5 + $0x72c] ss:$16 sps:$4 sm:$0xff]   ;;  %v3700_v55 = vld [vmem:[#allocation5 + $0x728] ss:$16 sps:$4 sm:$0xff]  }
 0x148   :  { %v2126_v2 = vpop.f32.mrf.mxu1  ;;  %2419 = vmatprep.subr.bf16.mxu1 %v3633_v59  ;;  %v3705_v54 = vld [vmem:[#allocation5 + $0x92c] ss:$16 sps:$4 sm:$0xff]   ;;  %v3703_v56 = vld [vmem:[#allocation5 + $0x928] ss:$16 sps:$4 sm:$0xff]  }
 0x149   :  { %v3708_v57 = vld [vmem:[#allocation5 + $0x70c] ss:$16 sps:$4 sm:$0xff]   ;;  %v3706_v59 = vld [vmem:[#allocation5 + $0x708] ss:$16 sps:$4 sm:$0xff]  }
 0x14a   :  { %2379 = vmatpush1.bf16.msra.mxu0 %v3628_v63  ;;  %v3711_v58 = vld [vmem:[#allocation5 + $0x90c] ss:$16 sps:$4 sm:$0xff]   ;;  %v3709_v61 = vld [vmem:[#allocation5 + $0x908] ss:$16 sps:$4 sm:$0xff]  }
 0x14b   :  { %2420 = vmatpush1.bf16.msra.mxu1 %v3631_v0  ;;  %2380 = vmatprep.subr.bf16.mxu0 %v3636_v3  ;;  %v3712_v9 = vld [vmem:[#allocation8 + $0x78] sm:$0xff]   ;;  %v3714_v63 = vld [vmem:[#allocation8 + $0x70] sm:$0xff]  }
 0x14c   :  { %2421 = vmatprep.subr.bf16.mxu1 %v3639_v4  ;;  %v3713_v20 = vld [vmem:[#allocation8 + $0x38] sm:$0xff]   ;;  %v3715_v3 = vld [vmem:[#allocation8 + $0x30] sm:$0xff]  }
 0x14e   :  { %2381 = vmatpush1.bf16.msra.mxu0 %v3634_v5 }
 0x14f   :  { %2422 = vmatpush1.bf16.msra.mxu1 %v3637_v40  ;;  %2382 = vmatprep.subr.bf16.mxu0 %v3642_v27  ;;  %v3716_v40 = vld [vmem:[#allocation8 + $0x68] sm:$0xff]  }
 0x150   :  { %2423 = vmatprep.subr.bf16.mxu1 %v3645_v6 }
 0x152   :  { %2383 = vmatpush1.bf16.msra.mxu0 %v3640_v7 }
 0x153   :  { %2424 = vmatpush1.bf16.msra.mxu1 %v3643_v10  ;;  %2384 = vmatprep.subr.bf16.mxu0 %v3648_v11  ;;  %v3717_v10 = vld [vmem:[#allocation8 + $0x28] sm:$0xff]   ;;  %v3718_v11 = vld [vmem:[#allocation8 + $0x60] sm:$0xff]  }
 0x154   :  { %2425 = vmatprep.subr.bf16.mxu1 %v3651_v12 }
 0x156   :  { %2385 = vmatpush1.bf16.msra.mxu0 %v3646_v13 }
 0x157   :  { %2426 = vmatpush1.bf16.msra.mxu1 %v3649_v14  ;;  %2386 = vmatprep.subr.bf16.mxu0 %v3654_v15  ;;  %v3729_v14 = vld [vmem:[#allocation8 + $0xb8] sm:$0xff]   ;;  %v3731_v15 = vld [vmem:[#allocation8 + $0xb0] sm:$0xff]  }
 0x158   :  { %2427 = vmatprep.subr.bf16.mxu1 %v3657_v16  ;;  %v3720_v16 = vld [vmem:[#allocation8 + $0x58] sm:$0xff]  }
 0x15a   :  { %2387 = vmatpush1.bf16.msra.mxu0 %v3652_v17  ;;  %v3732_v17 = vld [vmem:[#allocation8 + $0xe8] sm:$0xff]  }
 0x15b   :  { %2428 = vmatpush1.bf16.msra.mxu1 %v3655_v18  ;;  %2388 = vmatprep.subr.bf16.mxu0 %v3660_v19  ;;  %v3721_v18 = vld [vmem:[#allocation8 + $0x18] sm:$0xff]   ;;  %v3733_v19 = vld [vmem:[#allocation8 + $0xa8] sm:$0xff]  }
 0x15c   :  { %2429 = vmatprep.subr.bf16.mxu1 %v3663_v22  ;;  %v3722_v22 = vld [vmem:[#allocation8 + $0x50] sm:$0xff]  }
 0x15e   :  { %2389 = vmatpush1.bf16.msra.mxu0 %v3658_v23  ;;  %v3734_v23 = vld [vmem:[#allocation8 + $0xe0] sm:$0xff]  }
 0x15f   :  { %2430 = vmatpush1.bf16.msra.mxu1 %v3661_v24  ;;  %2390 = vmatprep.subr.bf16.mxu0 %v3666_v25  ;;  %v3723_v24 = vld [vmem:[#allocation8 + $0x10] sm:$0xff]   ;;  %v3735_v25 = vld [vmem:[#allocation8 + $0xa0] sm:$0xff]  }
 0x160   :  { %2431 = vmatprep.subr.bf16.mxu1 %v3669_v26  ;;  %v3724_v26 = vld [vmem:[#allocation8 + $0x48] sm:$0xff]  }
 0x162   :  { %2391 = vmatpush2.bf16.msra.mxu0 %v3664_v28  ;;  %v3736_v28 = vld [vmem:[#allocation8 + $0xd8] sm:$0xff]  }
 0x163   :  { %2432 = vmatpush2.bf16.msra.mxu1 %v3667_v29  ;;  %2392 = vmatprep.subr.bf16.mxu0 %v3672_v30  ;;  %v3725_v29 = vld [vmem:[#allocation8 + $0x8] sm:$0xff]   ;;  %v3737_v30 = vld [vmem:[#allocation8 + $0x98] sm:$0xff]  }
 0x164   :  { %2433 = vmatprep.subr.bf16.mxu1 %v3675_v31  ;;  %v3726_v31 = vld [vmem:[#allocation8 + $0x40] sm:$0xff]  }
 0x166   :  { %2393 = vmatpush2.bf16.msra.mxu0 %v3670_v32  ;;  %v3727_v32 = vld [vmem:[#allocation8] sm:$0xff]  }
 0x167   :  { %2434 = vmatpush2.bf16.msra.mxu1 %v3673_v34  ;;  %2394 = vmatprep.subr.bf16.mxu0 %v3678_v36  ;;  %v3738_v36 = vld [vmem:[#allocation8 + $0xd0] sm:$0xff]  }
 0x168   :  { %2435 = vmatprep.subr.bf16.mxu1 %v3681_v38  ;;  %v3739_v38 = vld [vmem:[#allocation8 + $0x90] sm:$0xff]  }
 0x16a   :  { %2395 = vmatpush2.bf16.msra.mxu0 %v3676_v39 }
 0x16b   :  { %2436 = vmatpush2.bf16.msra.mxu1 %v3679_v41  ;;  %2396 = vmatprep.subr.bf16.mxu0 %v3684_v42 }
 0x16c   :  { %2437 = vmatprep.subr.bf16.mxu1 %v3687_v43 }
 0x16e   :  { %2397 = vmatpush2.bf16.msra.mxu0 %v3682_v44 }
 0x16f   :  { %2438 = vmatpush2.bf16.msra.mxu1 %v3685_v45  ;;  %2398 = vmatprep.subr.bf16.mxu0 %v3690_v8  ;;  %v3740_v8 = vld [vmem:[#allocation8 + $0xc8] sm:$0xff]  }
 0x170   :  { %2439 = vmatprep.subr.bf16.mxu1 %v3693_v46 }
 0x172   :  { %2399 = vmatpush2.bf16.msra.mxu0 %v3688_v47  ;;  %v3741_v47 = vld [vmem:[#allocation8 + $0x88] sm:$0xff]  }
 0x173   :  { %2440 = vmatpush2.bf16.msra.mxu1 %v3691_v48  ;;  %2400 = vmatprep.subr.bf16.mxu0 %v3696_v50 }
 0x174   :  { %2441 = vmatprep.subr.bf16.mxu1 %v3699_v51 }
 0x176   :  { %2401 = vmatpush2.bf16.msra.mxu0 %v3694_v52 }
 0x177   :  { %2442 = vmatpush2.bf16.msra.mxu1 %v3697_v37  ;;  %2402 = vmatprep.subr.bf16.mxu0 %v3702_v53  ;;  %v3742_v53 = vld [vmem:[#allocation8 + $0xc0] sm:$0xff]  }
 0x178   :  { %2443 = vmatprep.subr.bf16.mxu1 %v3705_v54 }
 0x17a   :  { %2403 = vmatpush2.bf16.msra.mxu0 %v3700_v55  ;;  %v3743_v55 = vld [vmem:[#allocation8 + $0x80] sm:$0xff]  }
 0x17b   :  { %2444 = vmatpush2.bf16.msra.mxu1 %v3703_v56  ;;  %2404 = vmatprep.subr.bf16.mxu0 %v3708_v57  ;;  %v436_v57 = vsub.s32 2, %v3961_v35 }
 0x17c   :  { %2445 = vmatprep.subr.bf16.mxu1 %v3711_v58 }
 0x17d   :  { %v437_v58 = vrot.slane %v3964_v49, %v436_v57 }
 0x17e   :  { %2405 = vmatpush2.bf16.msra.mxu0 %v3706_v59 }
 0x17f   :  { %2446 = vmatpush2.bf16.msra.mxu1 %v3709_v61  ;;  %3178 = vmatprep.subr.bf16.mxu0 %v3712_v9 }
 0x181   :  { %v2162_v0 = vpop.f32.mrf.mxu0  ;;  %2407 = vmatmul.mubr.bf16.vlgmr.msra.gmra.mxu0 %v3947_v21  ;;  %v3728_v21 = vld [vmem:[#allocation8 + $0xf8] sm:$0xff]  }
 0x182   :  { %v2203_v1 = vpop.f32.mrf.mxu1  ;;  %2448 = vmatmul.mubr.bf16.vlgmr.msra.gmra.mxu1 %v3955_v33  ;;  %v2163_v2 = vadd.f32 %v2162_v0, %v3971_v60  ;;  %3179 = vmatpush3.bf16.msra.mxu0 %v3713_v20  ;;  %v3730_v33 = vld [vmem:[#allocation8 + $0xf0] sm:$0xff]   ;;  %v3719_v60 = vld [vmem:[#allocation8 + $0x20] sm:$0xff]  }
 0x183   :  { %v2164_v4 = vpop.f32.mrf.mxu0  ;;  %3180 = vmatprep.subr.bf16.mxu0 %v3714_v63  ;;  %3200 = vmatprep.subr.bf16.mxu1 %v3728_v21 }
 0x184   :  { %v2205_v5 = vpop.f32.mrf.mxu1  ;;  %v2204_v27 = vadd.f32 %v2203_v1, %v2163_v2  ;;  %3201 = vmatpush3.bf16.msra.mxu1 %v3729_v14  ;;  %v2165_v34 = vadd.f32 %v2164_v4, %v3975_v62 }
 0x185   :  { %v2166_v6 = vpop.f32.mrf.mxu0  ;;  %3202 = vmatprep.subr.bf16.mxu1 %v3730_v33 }
 0x186   :  { %v2207_v7 = vpop.f32.mrf.mxu1  ;;  %3181 = vmatpush3.bf16.msra.mxu0 %v3715_v3  ;;  %v2206_v42 = vadd.f32 %v2205_v5, %v2165_v34 }
 0x187   :  { %v2167_v12 = vpop.f32.mrf.mxu0  ;;  %3182 = vmatprep.subr.bf16.mxu0 %v3716_v40  ;;  %v440_v40 = vsub.s32 3, %v3961_v35 }
 0x188   :  { %v2208_v13 = vpop.f32.mrf.mxu1  ;;  %3203 = vmatpush3.bf16.msra.mxu1 %v3731_v15 }
 0x189   :  { %3204 = vmatprep.subr.bf16.mxu1 %v3732_v17 }
 0x18a   :  { %3183 = vmatpush3.bf16.msra.mxu0 %v3717_v10 }
 0x18b   :  { %3184 = vmatprep.subr.bf16.mxu0 %v3718_v11 }
 0x18c   :  { %3205 = vmatpush3.bf16.msra.mxu1 %v3733_v19 }
 0x18d   :  { %3206 = vmatprep.subr.bf16.mxu1 %v3734_v23 }
 0x18e   :  { %3185 = vmatpush3.bf16.msra.mxu0 %v3719_v60 }
 0x18f   :  { %3186 = vmatprep.subr.bf16.mxu0 %v3720_v16 }
 0x190   :  { %3207 = vmatpush3.bf16.msra.mxu1 %v3735_v25 }
 0x191   :  { %3208 = vmatprep.subr.bf16.mxu1 %v3736_v28 }
 0x192   :  { %3187 = vmatpush3.bf16.msra.mxu0 %v3721_v18 }
 0x193   :  { %3188 = vmatprep.subr.bf16.mxu0 %v3722_v22 }
 0x194   :  { %3209 = vmatpush3.bf16.msra.mxu1 %v3737_v30  ;;  %v3145_v30 = vld [vmem:[#allocation10] ss:$0 sm:$0xff] }
 0x195   :  { %3210 = vmatprep.subr.bf16.mxu1 %v3738_v36 }
 0x196   :  { %3189 = vmatpush3.bf16.msra.mxu0 %v3723_v24 }
 0x197   :  { %3190 = vmatprep.subr.bf16.mxu0 %v3724_v26 }
 0x198   :  { %3211 = vmatpush3.bf16.msra.mxu1 %v3739_v38 }
 0x199   :  { %3212 = vmatprep.subr.bf16.mxu1 %v3740_v8 }
 0x19a   :  { %3191 = vmatpush3.bf16.msra.mxu0 %v3725_v29 }
 0x19b   :  { %3192 = vmatprep.subr.bf16.mxu0 %v3726_v31 }
 0x19c   :  { %3213 = vmatpush3.bf16.msra.mxu1 %v3741_v47 }
 0x19d   :  { %3214 = vmatprep.subr.bf16.mxu1 %v3742_v53 }
 0x19e   :  { %3193 = vmatpush3.bf16.msra.mxu0 %v3727_v32 }
 0x1a0   :  { %3215 = vmatpush3.bf16.msra.mxu1 %v3743_v55 }
 0x1c1   :  { %v2244_v39 = vpop.f32.mrf.mxu0 }
 0x1c2   :  { %v2285_v41 = vpop.f32.mrf.mxu1  ;;  %v2245_v43 = vadd.f32 %v2244_v39, %v2204_v27  ;;  %v441_v27 = vrot.slane %v3964_v49, %v440_v40 }
 0x1c3   :  { %v2246_v44 = vpop.f32.mrf.mxu0  ;;  %v2286_v59 = vadd.f32 %v2285_v41, %v437_v58 }
 0x1c4   :  { %v2287_v45 = vpop.f32.mrf.mxu1  ;;  %v2247_v46 = vadd.f32 %v2246_v44, %v2206_v42  ;;  %v2456_v48 = vmax.f32 %v2245_v43, 0.0 }
 0x1c5   :  { %v2248_v50 = vpop.f32.mrf.mxu0  ;;  %v2288_v6 = vadd.f32 %v2287_v45, %v441_v27 }
 0x1c6   :  { %v2289_v51 = vpop.f32.mrf.mxu1  ;;  %v2457_v52 = vmax.f32 %v2247_v46, 0.0  ;;  %v2460_v56 = vpack.c.bf16 %v2456_v48, %v2456_v48 }
 0x1c7   :  { %v2249_v62 = vpop.f32.mrf.mxu0 }
 0x1c8   :  { %v2290_v37 = vpop.f32.mrf.mxu1  ;;  %v2461_v54 = vpack.c.bf16 %v2457_v52, %v2457_v52 }
 0x1ca   :  { %2759 = vmatprep.mubr.bf16.mxu0 %v2461_v54 }
 0x1cb   :  { %2760 = vmatmul.mubr.bf16.vlgmr.msra.gmra.mxu0 %v2460_v56 }
 0x201   :  { %v2326_v61 = vpop.f32.mrf.mxu0 }
 0x202   :  { %v2367_v9 = vpop.f32.mrf.mxu1  ;;  %v2327_v20 = vadd.f32 %v2326_v61, %v2286_v59 }
 0x203   :  { %v2328_v63 = vpop.f32.mrf.mxu0 }
 0x204   :  { %v2369_v0 = vpop.f32.mrf.mxu1  ;;  %v2368_v1 = vadd.f32 %v2367_v9, %v2327_v20  ;;  %v2329_v7 = vadd.f32 %v2328_v63, %v2288_v6 }
 0x205   :  { %v2330_v2 = vpop.f32.mrf.mxu0 }
 0x206   :  { %v2371_v3 = vpop.f32.mrf.mxu1  ;;  %v2370_v12 = vadd.f32 %v2369_v0, %v2329_v7 }
 0x207   :  { %v2331_v4 = vpop.f32.mrf.mxu0 }
 0x208   :  { %v2372_v5 = vpop.f32.mrf.mxu1 }
 0x241   :  { %v2408_v10 = vpop.f32.mrf.mxu0 }
 0x242   :  { %v2449_v11 = vpop.f32.mrf.mxu1  ;;  %v2409_v13 = vadd.f32 %v2408_v10, %v2368_v1 }
 0x243   :  { %v2410_v21 = vpop.f32.mrf.mxu0 }
 0x244   :  { %v2451_v14 = vpop.f32.mrf.mxu1  ;;  %v2450_v33 = vadd.f32 %v2449_v11, %v2409_v13  ;;  %v2411_v60 = vadd.f32 %v2410_v21, %v2370_v12 }
 0x245   :  { %v2412_v15 = vpop.f32.mrf.mxu0 }
 0x246   :  { %v2453_v16 = vpop.f32.mrf.mxu1  ;;  %v2452_v17 = vadd.f32 %v2451_v14, %v2411_v60  ;;  %v2458_v18 = vmax.f32 %v2450_v33, 0.0 }
 0x247   :  { %v2413_v19 = vpop.f32.mrf.mxu0 }
 0x248   :  { %v2454_v22 = vpop.f32.mrf.mxu1  ;;  %v2459_v23 = vmax.f32 %v2452_v17, 0.0  ;;  %v2462_v24 = vpack.c.bf16 %v2458_v18, %v2458_v18 }
 0x24a   :  { %v2463_v35 = vpack.c.bf16 %v2459_v23, %v2459_v23 }
 0x24c   :  { %2799 = vmatprep.mubr.bf16.mxu1 %v2463_v35 }
 0x24d   :  { %2800 = vmatmul.mubr.bf16.vlgmr.msra.gmra.mxu1 %v2462_v24 }
 0x28b   :  { %v3194_v49 = vpop.f32.mrf.mxu0 }
 0x28d   :  { %v3195_v25 = vpop.f32.mrf.mxu0 }
 0x28e   :  { %v3196_v26 = vadd.f32 %v3195_v25, %v3194_v49 }
 0x28f   :  { %v3197_v28 = vpop.f32.mrf.mxu0 }
 0x290   :  { %v2762_v34 = vadd.f32 %v3196_v26, %v3145_v30 }
 0x291   :  { %v3198_v29 = vpop.f32.mrf.mxu0 }
 0x30d   :  { %v3216_v31 = vpop.f32.mrf.mxu1 }
 0x30f   :  { %v3217_v32 = vpop.f32.mrf.mxu1 }
 0x310   :  { %v3218_v36 = vadd.f32 %v3217_v32, %v3216_v31 }
 0x311   :  { %v3219_v38 = vpop.f32.mrf.mxu1 }
 0x312   :  { %v2802_v39 = vadd.f32 %v3218_v36, %v2762_v34 }
 0x313   :  { %v3220_v41 = vpop.f32.mrf.mxu1 }
 0x314   :  { %2807 = vst [vmem:[#allocation11] sm:$0xff] %v2802_v39 }
 0x315   :  { %3855 = shalt.err (!%p3852_p1)
}
 0x316   :  { %2817 = dma.vmem_to_hbm [thread:$0]  %s2815_s4, 128, %s3993_s5, [#allocation4]  }
 0x317   :  { %3870 = dma.done.wait [#allocation4], 128  }
 0x318   :  { %3871 = vsyncadd [#allocation4], 4294967168 }
 0x319   :  { %2821 = vsyncpa [#allocation3], 1 }
 0x31a   :  { %2822 = vsyncpa [#allocation6], 1 }
 0x31b   :  { %2823 = vsyncpa [#allocation9], 1 }
 0x31c   :  { %2824 = vsyncpa [#allocation4], 1 }

</bundles_post_ra>
